<compile_context>
chip_gen: v6e
topology: v6e:2x2x1
jax: 0.10.0
libtpu: 0.0.40
codegen_flags: <defaults>
</compile_context>

<pallas_src>
import functools

import numpy as np
import jax
import jax.numpy as jnp
from jax.experimental import pallas as pl
from jax.experimental.pallas import tpu as pltpu

PAD = 0  # constants.PAD


def position_encoding_init(n_position, d_pos_vec):
    """Sinusoid position-encoding table (row 0 = PAD = zeros)."""
    position_enc = np.array(
        [[pos / np.power(10000, 2 * (j // 2) / d_pos_vec) for j in range(d_pos_vec)]
         if pos != 0 else np.zeros(d_pos_vec)
         for pos in range(n_position)])
    position_enc[1:, 0::2] = np.sin(position_enc[1:, 0::2])
    position_enc[1:, 1::2] = np.cos(position_enc[1:, 1::2])
    return jnp.asarray(position_enc, dtype=jnp.float32)


def encoder_stack_kernel(x_ref, mask_ref, wqkv_ref, wo_ref, bo_ref,
                         w1_ref, b1_ref, w2_ref, b2_ref,
                         g1_ref, be1_ref, g2_ref, be2_ref,
                         out_ref, act_ref,
                         *, n_head, d_k, d_v, eps=1e-6):
    """All encoder layers for one batch tile of TB sequences.

    grid = (B // TB, n_layers); the layer axis is 'arbitrary' (sequential,
    innermost) and the (TB*L, D) f32 activation is carried across it in
    `act_ref` VMEM scratch.
    """
    l_idx = pl.program_id(1)
    bf16 = jnp.bfloat16

    TB, _, L = mask_ref.shape
    HK = n_head * d_k
    HV = n_head * d_v

    # Layer 0: seed the carried activation from the embedded input block.
    @pl.when(l_idx == 0)
    def _():
        act_ref[...] = x_ref[...]

    x = act_ref[...]                      # (TB*L, D) f32 carried activation
    mask = mask_ref[...]                  # (TB, 1, L) additive pad bias (0 / -1e9)

    # ---- fused QKV projection: one (TB*L, D) x (D, 3*H*dk) bf16 matmul ----
    # 1/sqrt(d_k) is pre-folded into the Q columns of wqkv at init time.
    qkv = jnp.dot(x.astype(bf16), wqkv_ref[0],
                  preferred_element_type=jnp.float32).astype(bf16)  # (TB*L, 3HK)

    # Head-major (TB*H, L, d) views via static slices + one leading-dim stack.
    def gather_heads(col_off, d):
        return jnp.stack(
            [qkv[b * L:(b + 1) * L, col_off + h * d: col_off + (h + 1) * d]
             for b in range(TB) for h in range(n_head)], axis=0)

    q = gather_heads(0, d_k)              # (TB*H, L, d_k) bf16
    k = gather_heads(HK, d_k)             # (TB*H, L, d_k) bf16
    v = gather_heads(2 * HK, d_v)         # (TB*H, L, d_v) bf16

    # ---- batched scaled-dot-product attention over all (batch, head) ----
    s = jnp.einsum('nqd,nkd->nqk', q, k,
                   preferred_element_type=jnp.float32)              # (TB*H, L, L)
    m_full = jnp.concatenate(
        [mask[b:b + 1] for b in range(TB) for _ in range(n_head)], axis=0)
    s = s + m_full                        # additive key-PAD mask, broadcast over q
    s = s - jnp.max(s, axis=-1, keepdims=True)
    p = jnp.exp(s)
    p = p * pl.reciprocal(jnp.sum(p, axis=-1, keepdims=True), approx=True)
    o = jnp.einsum('nqk,nkd->nqd', p.astype(bf16), v,
                   preferred_element_type=jnp.float32).astype(bf16)  # (TB*H, L, dv)

    # In-register head concat -> lane-dense (TB*L, H*dv) slab, ONE output proj.
    heads = jnp.concatenate(
        [jnp.concatenate([o[b * n_head + h] for h in range(n_head)], axis=-1)
         for b in range(TB)], axis=0)
    attn = jnp.dot(heads, wo_ref[0],
                   preferred_element_type=jnp.float32) + bo_ref[0]

    # ---- residual + post-LayerNorm 1 (single-pass moments), f32 ----
    y = attn + x
    mu = jnp.mean(y, axis=-1, keepdims=True)
    var = jnp.mean(y * y, axis=-1, keepdims=True) - mu * mu
    y = (y - mu) * jax.lax.rsqrt(var + eps) * g1_ref[0] + be1_ref[0]

    # ---- position-wise FFN (Conv1d k=1 == matmul) + residual + LayerNorm 2 ----
    h1 = jnp.dot(y.astype(bf16), w1_ref[0],
                 preferred_element_type=jnp.float32) + b1_ref[0]
    h1 = jnp.maximum(h1, 0.0)
    h2 = jnp.dot(h1.astype(bf16), w2_ref[0],
                 preferred_element_type=jnp.float32) + b2_ref[0]
    z = h2 + y
    mu2 = jnp.mean(z, axis=-1, keepdims=True)
    var2 = jnp.mean(z * z, axis=-1, keepdims=True) - mu2 * mu2
    z = (z - mu2) * jax.lax.rsqrt(var2 + eps) * g2_ref[0] + be2_ref[0]

    act_ref[...] = z                      # carry to next layer

    @pl.when(l_idx == pl.num_programs(1) - 1)
    def _():
        out_ref[...] = z


def _vmem_budget_bytes(tb, L, D, n_head, d_k, d_v, d_inner):
    """Footprint-based VMEM budget, capped well below v7x's 64 MiB physical."""
    HK, HV = n_head * d_k, n_head * d_v
    w_layer = 2 * (D * 3 * HK + HV * D + D * d_inner + d_inner * D)   # bf16 weights
    w_layer += 4 * (D + d_inner + 5 * D)                              # f32 biases/LN
    rows = tb * L
    io = 4 * rows * D * 2 * 2 + 4 * tb * L * 2     # in/out blocks (dbl-buffered) + mask
    scratch = 4 * rows * D                         # carried activation
    transient = 4 * (rows * (3 * HK + HV) + tb * n_head * L * L * 3 + rows * d_inner)
    est = 2 * w_layer * 2 + io + scratch + transient   # double-buffered weights
    return int(min(48 * 1024 * 1024, max(32 * 1024 * 1024, 2 * est)))


def encoder_stack_pallas(x, mask_bias, sp, *, n_head, d_k, d_v, tb=None):
    """Run the whole encoder layer stack in one pallas_call."""
    B, L, D = x.shape
    n_layers = sp["wqkv"].shape[0]
    d_inner = sp["w1"].shape[-1]

    # Batch tile: biggest divisor of B whose slab stays VMEM-friendly.
    if tb is None:
        tb = 1
        for cand in range(1, B + 1):
            if B % cand == 0 and cand * L <= 1024:
                tb = cand
    assert B % tb == 0

    x_flat = x.reshape(B * L, D)          # flatten so all matmul LHS are 2-D slabs

    def lspec(shape):
        nd = len(shape)
        return pl.BlockSpec((1,) + tuple(shape[1:]),
                            lambda b, l, _nd=nd: (l,) + (0,) * (_nd - 1))

    kernel = functools.partial(encoder_stack_kernel,
                               n_head=n_head, d_k=d_k, d_v=d_v)
    out_flat = pl.pallas_call(
        kernel,
        out_shape=jax.ShapeDtypeStruct((B * L, D), jnp.float32),
        grid=(B // tb, n_layers),
        in_specs=[
            pl.BlockSpec((tb * L, D), lambda b, l: (b, 0)),    # embedded input slab
            pl.BlockSpec((tb, 1, L), lambda b, l: (b, 0, 0)),  # additive pad-key bias
            lspec(sp["wqkv"].shape),                           # (nl, D, 3*H*dk) bf16
            lspec(sp["wo"].shape),                             # (nl, H*dv, D)   bf16
            lspec(sp["bo"].shape),                             # (nl, 1, D)
            lspec(sp["w1"].shape),                             # (nl, D, d_inner) bf16
            lspec(sp["b1"].shape),                             # (nl, 1, d_inner)
            lspec(sp["w2"].shape),                             # (nl, d_inner, D) bf16
            lspec(sp["b2"].shape),                             # (nl, 1, D)
            lspec(sp["g1"].shape),                             # LN1 gamma
            lspec(sp["be1"].shape),                            # LN1 beta
            lspec(sp["g2"].shape),                             # LN2 gamma
            lspec(sp["be2"].shape),                            # LN2 beta
        ],
        out_specs=pl.BlockSpec((tb * L, D), lambda b, l: (b, 0)),
        scratch_shapes=[
            pltpu.VMEM((tb * L, D), jnp.float32),   # activation carried across layers
        ],
        compiler_params=pltpu.CompilerParams(
            # batch tiles leading + parallel (megacore/v7x 2-TC sharding);
            # layer axis innermost + arbitrary so the VMEM carry stays valid.
            dimension_semantics=("parallel", "arbitrary"),
            vmem_limit_bytes=_vmem_budget_bytes(tb, L, D, n_head, d_k, d_v, d_inner),
        ),
    )(x_flat, mask_bias, sp["wqkv"], sp["wo"], sp["bo"],
      sp["w1"], sp["b1"], sp["w2"], sp["b2"],
      sp["g1"], sp["be1"], sp["g2"], sp["be2"])
    return out_flat.reshape(B, L, D)


def init_params(key, n_vocab, n_position, d_model, d_inner, n_head, d_k, d_v, n_layers):
    keys = jax.random.split(key, 1 + n_layers)
    std = float(d_model) ** -0.5
    # src_word_emb.weight ~ N(mean=-d_model^-0.5, std=d_model^-0.5); PAD row = 0
    word_emb = jax.random.normal(keys[0], (n_vocab, d_model), jnp.float32) * std + (-std)
    word_emb = word_emb.at[PAD].set(0.0)
    pos_enc = position_encoding_init(n_position, d_model)   # frozen sinusoid table

    wqkv, wo, bo, w1, b1, w2, b2 = [], [], [], [], [], [], []
    g1, be1, g2, be2 = [], [], [], []
    inv_temper = float(d_k) ** -0.5
    for i in range(n_layers):
        lk = jax.random.split(keys[1 + i], 6)
        nrm = lambda k, shape, s=0.05: jax.random.normal(k, shape, jnp.float32) * s
        # fold 1/sqrt(d_k) into the Q projection (mathematically identical fwd)
        wq = nrm(lk[0], (d_model, n_head * d_k)) * inv_temper
        wk = nrm(lk[1], (d_model, n_head * d_k))
        wv = nrm(lk[2], (d_model, n_head * d_v))
        wqkv.append(jnp.concatenate([wq, wk, wv], axis=1))   # fused QKV weight
        wo.append(nrm(lk[3], (n_head * d_v, d_model)))
        bo.append(jnp.zeros((1, d_model), jnp.float32))
        w1.append(nrm(lk[4], (d_model, d_inner)))
        b1.append(jnp.zeros((1, d_inner), jnp.float32))
        w2.append(nrm(lk[5], (d_inner, d_model)))
        b2.append(jnp.zeros((1, d_model), jnp.float32))
        g1.append(jnp.ones((1, d_model), jnp.float32))
        be1.append(jnp.zeros((1, d_model), jnp.float32))
        g2.append(jnp.ones((1, d_model), jnp.float32))
        be2.append(jnp.zeros((1, d_model), jnp.float32))

    stack = dict(
        wqkv=jnp.stack(wqkv).astype(jnp.bfloat16),   # bf16 weights, f32 accumulation
        wo=jnp.stack(wo).astype(jnp.bfloat16),
        bo=jnp.stack(bo),
        w1=jnp.stack(w1).astype(jnp.bfloat16),
        b1=jnp.stack(b1),
        w2=jnp.stack(w2).astype(jnp.bfloat16),
        b2=jnp.stack(b2),
        g1=jnp.stack(g1), be1=jnp.stack(be1),
        g2=jnp.stack(g2), be2=jnp.stack(be2),
    )
    return dict(word_emb=word_emb, pos_enc=pos_enc, stack=stack)


def encoder_forward(params, src_seq, src_pos, *, d_model, n_head, d_k, d_v, scale=True):
    # glue: embedding gathers + additive padding-mask construction in plain JAX
    enc_input = params["word_emb"][src_seq]                     # (B, L, D)
    if scale:
        enc_input = enc_input * (float(d_model) ** 0.5)
    enc_input = enc_input + params["pos_enc"][src_pos]          # (B, L, D)
    # embed_dropout / per-layer dropouts: identity at inference
    mask_bias = jnp.where(src_seq == PAD, jnp.float32(-1e9),
                          jnp.float32(0.0))[:, None, :]          # (B, 1, L) additive
    enc_out = encoder_stack_pallas(enc_input, mask_bias, params["stack"],
                                   n_head=n_head, d_k=d_k, d_v=d_v)
    return (enc_out,)


if __name__ == "__main__":
    B, L = 2, 8
    # lane-dense small config: D, H*dk, d_inner are multiples of 128; L multiple of 8
    d_model, n_head, d_k, d_v = 128, 4, 32, 32
    d_inner_hid, n_layers_enc = 256, 2
    n_src_vocab = 50
    max_seq_len = L

    key = jax.random.PRNGKey(0)
    k_data, k_param = jax.random.split(key)

    params = init_params(k_param, n_src_vocab, max_seq_len + 1, d_model,
                         d_inner_hid, n_head, d_k, d_v, n_layers_enc)

    src_seq = jax.random.randint(k_data, (B, L), 1, n_src_vocab, dtype=jnp.int32)
    src_seq = src_seq.at[1, 6:].set(PAD)                        # pad tail of sequence 1
    positions = jnp.arange(1, L + 1, dtype=jnp.int32)[None, :]
    src_pos = jnp.where(src_seq != PAD, positions, PAD)

    (enc_out,) = encoder_forward(params, src_seq, src_pos,
                                 d_model=d_model, n_head=n_head, d_k=d_k, d_v=d_v)
    jax.block_until_ready(enc_out)
    assert enc_out.shape == (B, L, d_model) and enc_out.dtype == jnp.float32
    assert bool(jnp.all(jnp.isfinite(enc_out)))
    print("KERNEL_OK")
</pallas_src>

<mosaic_0001>
module attributes {stable_mosaic.version = 11 : i64} {
  func.func @encoder_stack_kernel(%arg0: i32, %arg1: i32, %arg2: memref<16x128xf32, #tpu.memory_space<vmem>>, %arg3: memref<2x1x8xf32, #tpu.memory_space<vmem>>, %arg4: memref<1x128x384xbf16, #tpu.memory_space<vmem>>, %arg5: memref<1x128x128xbf16, #tpu.memory_space<vmem>>, %arg6: memref<1x1x128xf32, #tpu.memory_space<vmem>>, %arg7: memref<1x128x256xbf16, #tpu.memory_space<vmem>>, %arg8: memref<1x1x256xf32, #tpu.memory_space<vmem>>, %arg9: memref<1x256x128xbf16, #tpu.memory_space<vmem>>, %arg10: memref<1x1x128xf32, #tpu.memory_space<vmem>>, %arg11: memref<1x1x128xf32, #tpu.memory_space<vmem>>, %arg12: memref<1x1x128xf32, #tpu.memory_space<vmem>>, %arg13: memref<1x1x128xf32, #tpu.memory_space<vmem>>, %arg14: memref<1x1x128xf32, #tpu.memory_space<vmem>>, %arg15: memref<16x128xf32, #tpu.memory_space<vmem>>, %arg16: memref<16x128xf32, #tpu.memory_space<vmem>>) attributes {dimension_semantics = [#tpu.dimension_semantics<parallel>, #tpu.dimension_semantics<arbitrary>], iteration_bounds = array<i64: 1, 2>, scalar_prefetch = 0 : i64, scratch_operands = 1 : i64, tpu.core_type = #tpu.core_type<tc>, window_params = [{transform_indices = @transform_0, window_bounds = array<i64: 16, 128>}, {transform_indices = @transform_1, window_bounds = array<i64: 2, 1, 8>}, {transform_indices = @transform_2, window_bounds = array<i64: 1, 128, 384>}, {transform_indices = @transform_3, window_bounds = array<i64: 1, 128, 128>}, {transform_indices = @transform_4, window_bounds = array<i64: 1, 1, 128>}, {transform_indices = @transform_5, window_bounds = array<i64: 1, 128, 256>}, {transform_indices = @transform_6, window_bounds = array<i64: 1, 1, 256>}, {transform_indices = @transform_7, window_bounds = array<i64: 1, 256, 128>}, {transform_indices = @transform_8, window_bounds = array<i64: 1, 1, 128>}, {transform_indices = @transform_9, window_bounds = array<i64: 1, 1, 128>}, {transform_indices = @transform_10, window_bounds = array<i64: 1, 1, 128>}, {transform_indices = @transform_11, window_bounds = array<i64: 1, 1, 128>}, {transform_indices = @transform_12, window_bounds = array<i64: 1, 1, 128>}, {transform_indices = @transform_13, window_bounds = array<i64: 16, 128>}]} {
    %c0_i32 = arith.constant 0 : i32
    %0 = arith.cmpi eq, %arg1, %c0_i32 : i32
    %1 = arith.extui %0 : i1 to i32
    %c0_i32_0 = arith.constant 0 : i32
    %2 = arith.cmpi ne, %1, %c0_i32_0 : i32
    scf.if %2 {
      %c0_59 = arith.constant 0 : index
      %c0_60 = arith.constant 0 : index
      %188 = vector.load %arg2[%c0_59, %c0_60] : memref<16x128xf32, #tpu.memory_space<vmem>>, vector<16x128xf32>
      %c0_61 = arith.constant 0 : index
      %c0_62 = arith.constant 0 : index
      %189 = vector.load %arg16[%c0_61, %c0_62] : memref<16x128xf32, #tpu.memory_space<vmem>>, vector<16x128xf32>
      tpu.vector_store %arg16[%c0_61, %c0_62], %188 {strides = array<i32>} : memref<16x128xf32, #tpu.memory_space<vmem>>, vector<16x128xf32>,
    } else {
    }
    %c0 = arith.constant 0 : index
    %c0_1 = arith.constant 0 : index
    %3 = vector.load %arg16[%c0, %c0_1] : memref<16x128xf32, #tpu.memory_space<vmem>>, vector<16x128xf32>
    %c0_2 = arith.constant 0 : index
    %c0_3 = arith.constant 0 : index
    %c0_4 = arith.constant 0 : index
    %4 = vector.load %arg3[%c0_2, %c0_3, %c0_4] : memref<2x1x8xf32, #tpu.memory_space<vmem>>, vector<2x1x8xf32>
    %5 = arith.truncf %3 : vector<16x128xf32> to vector<16x128xbf16>
    %c0_5 = arith.constant 0 : index
    %c0_6 = arith.constant 0 : index
    %c0_7 = arith.constant 0 : index
    %6 = vector.load %arg4[%c0_5, %c0_6, %c0_7] : memref<1x128x384xbf16, #tpu.memory_space<vmem>>, vector<1x128x384xbf16>
    %7 = vector.shape_cast %6 : vector<1x128x384xbf16> to vector<128x384xbf16>
    %cst = arith.constant dense<0.000000e+00> : vector<16x384xf32>
    %8 = tpu.matmul %5, %7, %cst {dimension_numbers = #tpu.dot_dimension_numbers<[1], [0], [0], [1], [0, 0, 1, 1], [], []>} : vector<16x128xbf16>, vector<128x384xbf16>, vector<16x384xf32> -> vector<16x384xf32>
    %9 = arith.truncf %8 : vector<16x384xf32> to vector<16x384xbf16>
    %10 = vector.extract_strided_slice %9 {offsets = [0, 0], sizes = [8, 32], strides = [1, 1]} : vector<16x384xbf16> to vector<8x32xbf16>
    %11 = vector.extract_strided_slice %9 {offsets = [0, 32], sizes = [8, 32], strides = [1, 1]} : vector<16x384xbf16> to vector<8x32xbf16>
    %12 = vector.extract_strided_slice %9 {offsets = [0, 64], sizes = [8, 32], strides = [1, 1]} : vector<16x384xbf16> to vector<8x32xbf16>
    %13 = vector.extract_strided_slice %9 {offsets = [0, 96], sizes = [8, 32], strides = [1, 1]} : vector<16x384xbf16> to vector<8x32xbf16>
    %14 = vector.extract_strided_slice %9 {offsets = [8, 0], sizes = [8, 32], strides = [1, 1]} : vector<16x384xbf16> to vector<8x32xbf16>
    %15 = vector.extract_strided_slice %9 {offsets = [8, 32], sizes = [8, 32], strides = [1, 1]} : vector<16x384xbf16> to vector<8x32xbf16>
    %16 = vector.extract_strided_slice %9 {offsets = [8, 64], sizes = [8, 32], strides = [1, 1]} : vector<16x384xbf16> to vector<8x32xbf16>
    %17 = vector.extract_strided_slice %9 {offsets = [8, 96], sizes = [8, 32], strides = [1, 1]} : vector<16x384xbf16> to vector<8x32xbf16>
    %18 = vector.shape_cast %10 : vector<8x32xbf16> to vector<1x8x32xbf16>
    %19 = vector.shape_cast %11 : vector<8x32xbf16> to vector<1x8x32xbf16>
    %20 = vector.shape_cast %12 : vector<8x32xbf16> to vector<1x8x32xbf16>
    %21 = vector.shape_cast %13 : vector<8x32xbf16> to vector<1x8x32xbf16>
    %22 = vector.shape_cast %14 : vector<8x32xbf16> to vector<1x8x32xbf16>
    %23 = vector.shape_cast %15 : vector<8x32xbf16> to vector<1x8x32xbf16>
    %24 = vector.shape_cast %16 : vector<8x32xbf16> to vector<1x8x32xbf16>
    %25 = vector.shape_cast %17 : vector<8x32xbf16> to vector<1x8x32xbf16>
    %26 = tpu.concatenate %18, %19, %20, %21, %22, %23, %24, %25 in 0 : vector<1x8x32xbf16>, vector<1x8x32xbf16>, vector<1x8x32xbf16>, vector<1x8x32xbf16>, vector<1x8x32xbf16>, vector<1x8x32xbf16>, vector<1x8x32xbf16>, vector<1x8x32xbf16> -> vector<8x8x32xbf16>
    %27 = vector.extract_strided_slice %9 {offsets = [0, 128], sizes = [8, 32], strides = [1, 1]} : vector<16x384xbf16> to vector<8x32xbf16>
    %28 = vector.extract_strided_slice %9 {offsets = [0, 160], sizes = [8, 32], strides = [1, 1]} : vector<16x384xbf16> to vector<8x32xbf16>
    %29 = vector.extract_strided_slice %9 {offsets = [0, 192], sizes = [8, 32], strides = [1, 1]} : vector<16x384xbf16> to vector<8x32xbf16>
    %30 = vector.extract_strided_slice %9 {offsets = [0, 224], sizes = [8, 32], strides = [1, 1]} : vector<16x384xbf16> to vector<8x32xbf16>
    %31 = vector.extract_strided_slice %9 {offsets = [8, 128], sizes = [8, 32], strides = [1, 1]} : vector<16x384xbf16> to vector<8x32xbf16>
    %32 = vector.extract_strided_slice %9 {offsets = [8, 160], sizes = [8, 32], strides = [1, 1]} : vector<16x384xbf16> to vector<8x32xbf16>
    %33 = vector.extract_strided_slice %9 {offsets = [8, 192], sizes = [8, 32], strides = [1, 1]} : vector<16x384xbf16> to vector<8x32xbf16>
    %34 = vector.extract_strided_slice %9 {offsets = [8, 224], sizes = [8, 32], strides = [1, 1]} : vector<16x384xbf16> to vector<8x32xbf16>
    %35 = vector.shape_cast %27 : vector<8x32xbf16> to vector<1x8x32xbf16>
    %36 = vector.shape_cast %28 : vector<8x32xbf16> to vector<1x8x32xbf16>
    %37 = vector.shape_cast %29 : vector<8x32xbf16> to vector<1x8x32xbf16>
    %38 = vector.shape_cast %30 : vector<8x32xbf16> to vector<1x8x32xbf16>
    %39 = vector.shape_cast %31 : vector<8x32xbf16> to vector<1x8x32xbf16>
    %40 = vector.shape_cast %32 : vector<8x32xbf16> to vector<1x8x32xbf16>
    %41 = vector.shape_cast %33 : vector<8x32xbf16> to vector<1x8x32xbf16>
    %42 = vector.shape_cast %34 : vector<8x32xbf16> to vector<1x8x32xbf16>
    %43 = tpu.concatenate %35, %36, %37, %38, %39, %40, %41, %42 in 0 : vector<1x8x32xbf16>, vector<1x8x32xbf16>, vector<1x8x32xbf16>, vector<1x8x32xbf16>, vector<1x8x32xbf16>, vector<1x8x32xbf16>, vector<1x8x32xbf16>, vector<1x8x32xbf16> -> vector<8x8x32xbf16>
    %44 = vector.extract_strided_slice %9 {offsets = [0, 256], sizes = [8, 32], strides = [1, 1]} : vector<16x384xbf16> to vector<8x32xbf16>
    %45 = vector.extract_strided_slice %9 {offsets = [0, 288], sizes = [8, 32], strides = [1, 1]} : vector<16x384xbf16> to vector<8x32xbf16>
    %46 = vector.extract_strided_slice %9 {offsets = [0, 320], sizes = [8, 32], strides = [1, 1]} : vector<16x384xbf16> to vector<8x32xbf16>
    %47 = vector.extract_strided_slice %9 {offsets = [0, 352], sizes = [8, 32], strides = [1, 1]} : vector<16x384xbf16> to vector<8x32xbf16>
    %48 = vector.extract_strided_slice %9 {offsets = [8, 256], sizes = [8, 32], strides = [1, 1]} : vector<16x384xbf16> to vector<8x32xbf16>
    %49 = vector.extract_strided_slice %9 {offsets = [8, 288], sizes = [8, 32], strides = [1, 1]} : vector<16x384xbf16> to vector<8x32xbf16>
    %50 = vector.extract_strided_slice %9 {offsets = [8, 320], sizes = [8, 32], strides = [1, 1]} : vector<16x384xbf16> to vector<8x32xbf16>
    %51 = vector.extract_strided_slice %9 {offsets = [8, 352], sizes = [8, 32], strides = [1, 1]} : vector<16x384xbf16> to vector<8x32xbf16>
    %52 = vector.shape_cast %44 : vector<8x32xbf16> to vector<1x8x32xbf16>
    %53 = vector.shape_cast %45 : vector<8x32xbf16> to vector<1x8x32xbf16>
    %54 = vector.shape_cast %46 : vector<8x32xbf16> to vector<1x8x32xbf16>
    %55 = vector.shape_cast %47 : vector<8x32xbf16> to vector<1x8x32xbf16>
    %56 = vector.shape_cast %48 : vector<8x32xbf16> to vector<1x8x32xbf16>
    %57 = vector.shape_cast %49 : vector<8x32xbf16> to vector<1x8x32xbf16>
    %58 = vector.shape_cast %50 : vector<8x32xbf16> to vector<1x8x32xbf16>
    %59 = vector.shape_cast %51 : vector<8x32xbf16> to vector<1x8x32xbf16>
    %60 = tpu.concatenate %52, %53, %54, %55, %56, %57, %58, %59 in 0 : vector<1x8x32xbf16>, vector<1x8x32xbf16>, vector<1x8x32xbf16>, vector<1x8x32xbf16>, vector<1x8x32xbf16>, vector<1x8x32xbf16>, vector<1x8x32xbf16>, vector<1x8x32xbf16> -> vector<8x8x32xbf16>
    "tpu.trace_start"() <{level = 10 : i32, message = "nqd,nkd->nqk"}> : () -> ()
    %cst_8 = arith.constant dense<0.000000e+00> : vector<8x8x8xf32>
    %61 = tpu.matmul %26, %43, %cst_8 {dimension_numbers = #tpu.dot_dimension_numbers<[2], [2], [1], [1], [0, 0, 0, 1, 1, 1], [0], [0]>} : vector<8x8x32xbf16>, vector<8x8x32xbf16>, vector<8x8x8xf32> -> vector<8x8x8xf32>
    "tpu.trace_stop"() : () -> ()
    %62 = vector.extract_strided_slice %4 {offsets = [0, 0, 0], sizes = [1, 1, 8], strides = [1, 1, 1]} : vector<2x1x8xf32> to vector<1x1x8xf32>
    %63 = vector.extract_strided_slice %4 {offsets = [0, 0, 0], sizes = [1, 1, 8], strides = [1, 1, 1]} : vector<2x1x8xf32> to vector<1x1x8xf32>
    %64 = vector.extract_strided_slice %4 {offsets = [0, 0, 0], sizes = [1, 1, 8], strides = [1, 1, 1]} : vector<2x1x8xf32> to vector<1x1x8xf32>
    %65 = vector.extract_strided_slice %4 {offsets = [0, 0, 0], sizes = [1, 1, 8], strides = [1, 1, 1]} : vector<2x1x8xf32> to vector<1x1x8xf32>
    %66 = vector.extract_strided_slice %4 {offsets = [1, 0, 0], sizes = [1, 1, 8], strides = [1, 1, 1]} : vector<2x1x8xf32> to vector<1x1x8xf32>
    %67 = vector.extract_strided_slice %4 {offsets = [1, 0, 0], sizes = [1, 1, 8], strides = [1, 1, 1]} : vector<2x1x8xf32> to vector<1x1x8xf32>
    %68 = vector.extract_strided_slice %4 {offsets = [1, 0, 0], sizes = [1, 1, 8], strides = [1, 1, 1]} : vector<2x1x8xf32> to vector<1x1x8xf32>
    %69 = vector.extract_strided_slice %4 {offsets = [1, 0, 0], sizes = [1, 1, 8], strides = [1, 1, 1]} : vector<2x1x8xf32> to vector<1x1x8xf32>
    %70 = tpu.concatenate %62, %63, %64, %65, %66, %67, %68, %69 in 0 : vector<1x1x8xf32>, vector<1x1x8xf32>, vector<1x1x8xf32>, vector<1x1x8xf32>, vector<1x1x8xf32>, vector<1x1x8xf32>, vector<1x1x8xf32>, vector<1x1x8xf32> -> vector<8x1x8xf32>
    %71 = vector.broadcast %70 : vector<8x1x8xf32> to vector<8x8x8xf32>
    %72 = arith.addf %61, %71 : vector<8x8x8xf32>
    %cst_9 = arith.constant dense<0xFF800000> : vector<8x8xf32>
    %73 = vector.multi_reduction <maximumf>, %72, %cst_9 [2] : vector<8x8x8xf32> to vector<8x8xf32>
    %74 = vector.shape_cast %73 : vector<8x8xf32> to vector<8x8x1xf32>
    %75 = vector.broadcast %74 : vector<8x8x1xf32> to vector<8x8x8xf32>
    %76 = arith.subf %72, %75 : vector<8x8x8xf32>
    %77 = math.exp %76 : vector<8x8x8xf32>
    %cst_10 = arith.constant dense<0.000000e+00> : vector<8x8xf32>
    %78 = vector.multi_reduction <add>, %77, %cst_10 [2] : vector<8x8x8xf32> to vector<8x8xf32>
    %79 = vector.shape_cast %78 : vector<8x8xf32> to vector<8x8x1xf32>
    %80 = tpu.reciprocal %79 {approx = true} : vector<8x8x1xf32> -> vector<8x8x1xf32>
    %81 = vector.broadcast %80 : vector<8x8x1xf32> to vector<8x8x8xf32>
    %82 = arith.mulf %77, %81 : vector<8x8x8xf32>
    %83 = arith.truncf %82 : vector<8x8x8xf32> to vector<8x8x8xbf16>
    "tpu.trace_start"() <{level = 10 : i32, message = "nqk,nkd->nqd"}> : () -> ()
    %cst_11 = arith.constant dense<0.000000e+00> : vector<8x8x32xf32>
    %84 = tpu.matmul %83, %60, %cst_11 {dimension_numbers = #tpu.dot_dimension_numbers<[2], [1], [1], [2], [0, 0, 0, 1, 1, 2], [0], [0]>} : vector<8x8x8xbf16>, vector<8x8x32xbf16>, vector<8x8x32xf32> -> vector<8x8x32xf32>
    "tpu.trace_stop"() : () -> ()
    %85 = arith.truncf %84 : vector<8x8x32xf32> to vector<8x8x32xbf16>
    %86 = vector.extract_strided_slice %85 {offsets = [0, 0, 0], sizes = [1, 8, 32], strides = [1, 1, 1]} : vector<8x8x32xbf16> to vector<1x8x32xbf16>
    %87 = vector.shape_cast %86 : vector<1x8x32xbf16> to vector<8x32xbf16>
    %88 = vector.extract_strided_slice %85 {offsets = [1, 0, 0], sizes = [1, 8, 32], strides = [1, 1, 1]} : vector<8x8x32xbf16> to vector<1x8x32xbf16>
    %89 = vector.shape_cast %88 : vector<1x8x32xbf16> to vector<8x32xbf16>
    %90 = vector.extract_strided_slice %85 {offsets = [2, 0, 0], sizes = [1, 8, 32], strides = [1, 1, 1]} : vector<8x8x32xbf16> to vector<1x8x32xbf16>
    %91 = vector.shape_cast %90 : vector<1x8x32xbf16> to vector<8x32xbf16>
    %92 = vector.extract_strided_slice %85 {offsets = [3, 0, 0], sizes = [1, 8, 32], strides = [1, 1, 1]} : vector<8x8x32xbf16> to vector<1x8x32xbf16>
    %93 = vector.shape_cast %92 : vector<1x8x32xbf16> to vector<8x32xbf16>
    %94 = tpu.concatenate %87, %89, %91, %93 in 1 : vector<8x32xbf16>, vector<8x32xbf16>, vector<8x32xbf16>, vector<8x32xbf16> -> vector<8x128xbf16>
    %95 = vector.extract_strided_slice %85 {offsets = [4, 0, 0], sizes = [1, 8, 32], strides = [1, 1, 1]} : vector<8x8x32xbf16> to vector<1x8x32xbf16>
    %96 = vector.shape_cast %95 : vector<1x8x32xbf16> to vector<8x32xbf16>
    %97 = vector.extract_strided_slice %85 {offsets = [5, 0, 0], sizes = [1, 8, 32], strides = [1, 1, 1]} : vector<8x8x32xbf16> to vector<1x8x32xbf16>
    %98 = vector.shape_cast %97 : vector<1x8x32xbf16> to vector<8x32xbf16>
    %99 = vector.extract_strided_slice %85 {offsets = [6, 0, 0], sizes = [1, 8, 32], strides = [1, 1, 1]} : vector<8x8x32xbf16> to vector<1x8x32xbf16>
    %100 = vector.shape_cast %99 : vector<1x8x32xbf16> to vector<8x32xbf16>
    %101 = vector.extract_strided_slice %85 {offsets = [7, 0, 0], sizes = [1, 8, 32], strides = [1, 1, 1]} : vector<8x8x32xbf16> to vector<1x8x32xbf16>
    %102 = vector.shape_cast %101 : vector<1x8x32xbf16> to vector<8x32xbf16>
    %103 = tpu.concatenate %96, %98, %100, %102 in 1 : vector<8x32xbf16>, vector<8x32xbf16>, vector<8x32xbf16>, vector<8x32xbf16> -> vector<8x128xbf16>
    %104 = tpu.concatenate %94, %103 in 0 : vector<8x128xbf16>, vector<8x128xbf16> -> vector<16x128xbf16>
    %c0_12 = arith.constant 0 : index
    %c0_13 = arith.constant 0 : index
    %c0_14 = arith.constant 0 : index
    %105 = vector.load %arg5[%c0_12, %c0_13, %c0_14] : memref<1x128x128xbf16, #tpu.memory_space<vmem>>, vector<1x128x128xbf16>
    %106 = vector.shape_cast %105 : vector<1x128x128xbf16> to vector<128x128xbf16>
    %cst_15 = arith.constant dense<0.000000e+00> : vector<16x128xf32>
    %107 = tpu.matmul %104, %106, %cst_15 {dimension_numbers = #tpu.dot_dimension_numbers<[1], [0], [0], [1], [0, 0, 1, 1], [], []>} : vector<16x128xbf16>, vector<128x128xbf16>, vector<16x128xf32> -> vector<16x128xf32>
    %c0_16 = arith.constant 0 : index
    %c0_17 = arith.constant 0 : index
    %c0_18 = arith.constant 0 : index
    %108 = vector.load %arg6[%c0_16, %c0_17, %c0_18] : memref<1x1x128xf32, #tpu.memory_space<vmem>>, vector<1x1x128xf32>
    %109 = vector.shape_cast %108 : vector<1x1x128xf32> to vector<1x128xf32>
    %110 = vector.broadcast %109 : vector<1x128xf32> to vector<16x128xf32>
    %111 = arith.addf %107, %110 : vector<16x128xf32>
    %112 = arith.addf %111, %3 : vector<16x128xf32>
    %cst_19 = arith.constant dense<0.000000e+00> : vector<16xf32>
    %113 = vector.multi_reduction <add>, %112, %cst_19 [1] : vector<16x128xf32> to vector<16xf32>
    %114 = vector.shape_cast %113 : vector<16xf32> to vector<16x1xf32>
    %cst_20 = arith.constant 1.280000e+02 : f32
    %115 = vector.broadcast %cst_20 : f32 to vector<16x1xf32>
    %116 = arith.divf %114, %115 : vector<16x1xf32>
    %117 = arith.mulf %112, %112 : vector<16x128xf32>
    %cst_21 = arith.constant dense<0.000000e+00> : vector<16xf32>
    %118 = vector.multi_reduction <add>, %117, %cst_21 [1] : vector<16x128xf32> to vector<16xf32>
    %119 = vector.shape_cast %118 : vector<16xf32> to vector<16x1xf32>
    %cst_22 = arith.constant 1.280000e+02 : f32
    %120 = vector.broadcast %cst_22 : f32 to vector<16x1xf32>
    %121 = arith.divf %119, %120 : vector<16x1xf32>
    %122 = arith.mulf %116, %116 : vector<16x1xf32>
    %123 = arith.subf %121, %122 : vector<16x1xf32>
    %124 = vector.broadcast %116 : vector<16x1xf32> to vector<16x128xf32>
    %125 = arith.subf %112, %124 : vector<16x128xf32>
    %cst_23 = arith.constant 9.99999997E-7 : f32
    %126 = vector.broadcast %cst_23 : f32 to vector<16x1xf32>
    %127 = arith.addf %123, %126 : vector<16x1xf32>
    %128 = math.rsqrt %127 : vector<16x1xf32>
    %129 = vector.broadcast %128 : vector<16x1xf32> to vector<16x128xf32>
    %130 = arith.mulf %125, %129 : vector<16x128xf32>
    %c0_24 = arith.constant 0 : index
    %c0_25 = arith.constant 0 : index
    %c0_26 = arith.constant 0 : index
    %131 = vector.load %arg11[%c0_24, %c0_25, %c0_26] : memref<1x1x128xf32, #tpu.memory_space<vmem>>, vector<1x1x128xf32>
    %132 = vector.shape_cast %131 : vector<1x1x128xf32> to vector<1x128xf32>
    %133 = vector.broadcast %132 : vector<1x128xf32> to vector<16x128xf32>
    %134 = arith.mulf %130, %133 : vector<16x128xf32>
    %c0_27 = arith.constant 0 : index
    %c0_28 = arith.constant 0 : index
    %c0_29 = arith.constant 0 : index
    %135 = vector.load %arg12[%c0_27, %c0_28, %c0_29] : memref<1x1x128xf32, #tpu.memory_space<vmem>>, vector<1x1x128xf32>
    %136 = vector.shape_cast %135 : vector<1x1x128xf32> to vector<1x128xf32>
    %137 = vector.broadcast %136 : vector<1x128xf32> to vector<16x128xf32>
    %138 = arith.addf %134, %137 : vector<16x128xf32>
    %139 = arith.truncf %138 : vector<16x128xf32> to vector<16x128xbf16>
    %c0_30 = arith.constant 0 : index
    %c0_31 = arith.constant 0 : index
    %c0_32 = arith.constant 0 : index
    %140 = vector.load %arg7[%c0_30, %c0_31, %c0_32] : memref<1x128x256xbf16, #tpu.memory_space<vmem>>, vector<1x128x256xbf16>
    %141 = vector.shape_cast %140 : vector<1x128x256xbf16> to vector<128x256xbf16>
    %cst_33 = arith.constant dense<0.000000e+00> : vector<16x256xf32>
    %142 = tpu.matmul %139, %141, %cst_33 {dimension_numbers = #tpu.dot_dimension_numbers<[1], [0], [0], [1], [0, 0, 1, 1], [], []>} : vector<16x128xbf16>, vector<128x256xbf16>, vector<16x256xf32> -> vector<16x256xf32>
    %c0_34 = arith.constant 0 : index
    %c0_35 = arith.constant 0 : index
    %c0_36 = arith.constant 0 : index
    %143 = vector.load %arg8[%c0_34, %c0_35, %c0_36] : memref<1x1x256xf32, #tpu.memory_space<vmem>>, vector<1x1x256xf32>
    %144 = vector.shape_cast %143 : vector<1x1x256xf32> to vector<1x256xf32>
    %145 = vector.broadcast %144 : vector<1x256xf32> to vector<16x256xf32>
    %146 = arith.addf %142, %145 : vector<16x256xf32>
    %cst_37 = arith.constant 0.000000e+00 : f32
    %147 = vector.broadcast %cst_37 : f32 to vector<16x256xf32>
    %148 = arith.maximumf %146, %147 : vector<16x256xf32>
    %149 = arith.truncf %148 : vector<16x256xf32> to vector<16x256xbf16>
    %c0_38 = arith.constant 0 : index
    %c0_39 = arith.constant 0 : index
    %c0_40 = arith.constant 0 : index
    %150 = vector.load %arg9[%c0_38, %c0_39, %c0_40] : memref<1x256x128xbf16, #tpu.memory_space<vmem>>, vector<1x256x128xbf16>
    %151 = vector.shape_cast %150 : vector<1x256x128xbf16> to vector<256x128xbf16>
    %cst_41 = arith.constant dense<0.000000e+00> : vector<16x128xf32>
    %152 = tpu.matmul %149, %151, %cst_41 {dimension_numbers = #tpu.dot_dimension_numbers<[1], [0], [0], [1], [0, 0, 1, 1], [], []>} : vector<16x256xbf16>, vector<256x128xbf16>, vector<16x128xf32> -> vector<16x128xf32>
    %c0_42 = arith.constant 0 : index
    %c0_43 = arith.constant 0 : index
    %c0_44 = arith.constant 0 : index
    %153 = vector.load %arg10[%c0_42, %c0_43, %c0_44] : memref<1x1x128xf32, #tpu.memory_space<vmem>>, vector<1x1x128xf32>
    %154 = vector.shape_cast %153 : vector<1x1x128xf32> to vector<1x128xf32>
    %155 = vector.broadcast %154 : vector<1x128xf32> to vector<16x128xf32>
    %156 = arith.addf %152, %155 : vector<16x128xf32>
    %157 = arith.addf %156, %138 : vector<16x128xf32>
    %cst_45 = arith.constant dense<0.000000e+00> : vector<16xf32>
    %158 = vector.multi_reduction <add>, %157, %cst_45 [1] : vector<16x128xf32> to vector<16xf32>
    %159 = vector.shape_cast %158 : vector<16xf32> to vector<16x1xf32>
    %cst_46 = arith.constant 1.280000e+02 : f32
    %160 = vector.broadcast %cst_46 : f32 to vector<16x1xf32>
    %161 = arith.divf %159, %160 : vector<16x1xf32>
    %162 = arith.mulf %157, %157 : vector<16x128xf32>
    %cst_47 = arith.constant dense<0.000000e+00> : vector<16xf32>
    %163 = vector.multi_reduction <add>, %162, %cst_47 [1] : vector<16x128xf32> to vector<16xf32>
    %164 = vector.shape_cast %163 : vector<16xf32> to vector<16x1xf32>
    %cst_48 = arith.constant 1.280000e+02 : f32
    %165 = vector.broadcast %cst_48 : f32 to vector<16x1xf32>
    %166 = arith.divf %164, %165 : vector<16x1xf32>
    %167 = arith.mulf %161, %161 : vector<16x1xf32>
    %168 = arith.subf %166, %167 : vector<16x1xf32>
    %169 = vector.broadcast %161 : vector<16x1xf32> to vector<16x128xf32>
    %170 = arith.subf %157, %169 : vector<16x128xf32>
    %cst_49 = arith.constant 9.99999997E-7 : f32
    %171 = vector.broadcast %cst_49 : f32 to vector<16x1xf32>
    %172 = arith.addf %168, %171 : vector<16x1xf32>
    %173 = math.rsqrt %172 : vector<16x1xf32>
    %174 = vector.broadcast %173 : vector<16x1xf32> to vector<16x128xf32>
    %175 = arith.mulf %170, %174 : vector<16x128xf32>
    %c0_50 = arith.constant 0 : index
    %c0_51 = arith.constant 0 : index
    %c0_52 = arith.constant 0 : index
    %176 = vector.load %arg13[%c0_50, %c0_51, %c0_52] : memref<1x1x128xf32, #tpu.memory_space<vmem>>, vector<1x1x128xf32>
    %177 = vector.shape_cast %176 : vector<1x1x128xf32> to vector<1x128xf32>
    %178 = vector.broadcast %177 : vector<1x128xf32> to vector<16x128xf32>
    %179 = arith.mulf %175, %178 : vector<16x128xf32>
    %c0_53 = arith.constant 0 : index
    %c0_54 = arith.constant 0 : index
    %c0_55 = arith.constant 0 : index
    %180 = vector.load %arg14[%c0_53, %c0_54, %c0_55] : memref<1x1x128xf32, #tpu.memory_space<vmem>>, vector<1x1x128xf32>
    %181 = vector.shape_cast %180 : vector<1x1x128xf32> to vector<1x128xf32>
    %182 = vector.broadcast %181 : vector<1x128xf32> to vector<16x128xf32>
    %183 = arith.addf %179, %182 : vector<16x128xf32>
    %c0_56 = arith.constant 0 : index
    %c0_57 = arith.constant 0 : index
    %184 = vector.load %arg16[%c0_56, %c0_57] : memref<16x128xf32, #tpu.memory_space<vmem>>, vector<16x128xf32>
    tpu.vector_store %arg16[%c0_56, %c0_57], %183 {strides = array<i32>} : memref<16x128xf32, #tpu.memory_space<vmem>>, vector<16x128xf32>,
    %c1_i32 = arith.constant 1 : i32
    %185 = arith.cmpi eq, %arg1, %c1_i32 : i32
    %186 = arith.extui %185 : i1 to i32
    %c0_i32_58 = arith.constant 0 : i32
    %187 = arith.cmpi ne, %186, %c0_i32_58 : i32
    scf.if %187 {
      %c0_59 = arith.constant 0 : index
      %c0_60 = arith.constant 0 : index
      %188 = vector.load %arg15[%c0_59, %c0_60] : memref<16x128xf32, #tpu.memory_space<vmem>>, vector<16x128xf32>
      tpu.vector_store %arg15[%c0_59, %c0_60], %183 {strides = array<i32>} : memref<16x128xf32, #tpu.memory_space<vmem>>, vector<16x128xf32>,
    } else {
    }
    return
  }
  func.func @transform_0(%arg0: i32, %arg1: i32) -> (i32, i32) {
    %c0_i32 = arith.constant 0 : i32
    %c0_i32_0 = arith.constant 0 : i32
    return %arg0, %c0_i32 : i32, i32
  }
  func.func @transform_1(%arg0: i32, %arg1: i32) -> (i32, i32, i32) {
    %c0_i32 = arith.constant 0 : i32
    %c0_i32_0 = arith.constant 0 : i32
    %c0_i32_1 = arith.constant 0 : i32
    return %arg0, %c0_i32, %c0_i32_0 : i32, i32, i32
  }
  func.func @transform_2(%arg0: i32, %arg1: i32) -> (i32, i32, i32) {
    %c0_i32 = arith.constant 0 : i32
    %c0_i32_0 = arith.constant 0 : i32
    %c0_i32_1 = arith.constant 0 : i32
    return %arg1, %c0_i32, %c0_i32_0 : i32, i32, i32
  }
  func.func @transform_3(%arg0: i32, %arg1: i32) -> (i32, i32, i32) {
    %c0_i32 = arith.constant 0 : i32
    %c0_i32_0 = arith.constant 0 : i32
    %c0_i32_1 = arith.constant 0 : i32
    return %arg1, %c0_i32, %c0_i32_0 : i32, i32, i32
  }
  func.func @transform_4(%arg0: i32, %arg1: i32) -> (i32, i32, i32) {
    %c0_i32 = arith.constant 0 : i32
    %c0_i32_0 = arith.constant 0 : i32
    %c0_i32_1 = arith.constant 0 : i32
    return %arg1, %c0_i32, %c0_i32_0 : i32, i32, i32
  }
  func.func @transform_5(%arg0: i32, %arg1: i32) -> (i32, i32, i32) {
    %c0_i32 = arith.constant 0 : i32
    %c0_i32_0 = arith.constant 0 : i32
    %c0_i32_1 = arith.constant 0 : i32
    return %arg1, %c0_i32, %c0_i32_0 : i32, i32, i32
  }
  func.func @transform_6(%arg0: i32, %arg1: i32) -> (i32, i32, i32) {
    %c0_i32 = arith.constant 0 : i32
    %c0_i32_0 = arith.constant 0 : i32
    %c0_i32_1 = arith.constant 0 : i32
    return %arg1, %c0_i32, %c0_i32_0 : i32, i32, i32
  }
  func.func @transform_7(%arg0: i32, %arg1: i32) -> (i32, i32, i32) {
    %c0_i32 = arith.constant 0 : i32
    %c0_i32_0 = arith.constant 0 : i32
    %c0_i32_1 = arith.constant 0 : i32
    return %arg1, %c0_i32, %c0_i32_0 : i32, i32, i32
  }
  func.func @transform_8(%arg0: i32, %arg1: i32) -> (i32, i32, i32) {
    %c0_i32 = arith.constant 0 : i32
    %c0_i32_0 = arith.constant 0 : i32
    %c0_i32_1 = arith.constant 0 : i32
    return %arg1, %c0_i32, %c0_i32_0 : i32, i32, i32
  }
  func.func @transform_9(%arg0: i32, %arg1: i32) -> (i32, i32, i32) {
    %c0_i32 = arith.constant 0 : i32
    %c0_i32_0 = arith.constant 0 : i32
    %c0_i32_1 = arith.constant 0 : i32
    return %arg1, %c0_i32, %c0_i32_0 : i32, i32, i32
  }
  func.func @transform_10(%arg0: i32, %arg1: i32) -> (i32, i32, i32) {
    %c0_i32 = arith.constant 0 : i32
    %c0_i32_0 = arith.constant 0 : i32
    %c0_i32_1 = arith.constant 0 : i32
    return %arg1, %c0_i32, %c0_i32_0 : i32, i32, i32
  }
  func.func @transform_11(%arg0: i32, %arg1: i32) -> (i32, i32, i32) {
    %c0_i32 = arith.constant 0 : i32
    %c0_i32_0 = arith.constant 0 : i32
    %c0_i32_1 = arith.constant 0 : i32
    return %arg1, %c0_i32, %c0_i32_0 : i32, i32, i32
  }
  func.func @transform_12(%arg0: i32, %arg1: i32) -> (i32, i32, i32) {
    %c0_i32 = arith.constant 0 : i32
    %c0_i32_0 = arith.constant 0 : i32
    %c0_i32_1 = arith.constant 0 : i32
    return %arg1, %c0_i32, %c0_i32_0 : i32, i32, i32
  }
  func.func @transform_13(%arg0: i32, %arg1: i32) -> (i32, i32) {
    %c0_i32 = arith.constant 0 : i32
    %c0_i32_0 = arith.constant 0 : i32
    return %arg0, %c0_i32 : i32, i32
  }
}

</mosaic_0001>

<bundles_post_ra>
// kernel: tpu_custom_call.1
= control target key start
LH: loop header
LB: loop body
LE: loop exit
PB: predicated region body
PF: predicated region fallthrough
CT: control target
= control target key end

     0   :  { %s4142_s0 = inlined_call_operand.hbm [shape: f32[16,128], index: 0, kind: input, shape index: {}]   ;;  %s4143_s1 = inlined_call_operand.hbm [shape: f32[2,1,8], index: 1, kind: input, shape index: {}]   ;;  %s4144_s2 = inlined_call_operand.hbm [shape: bf16[2,128,384], index: 2, kind: input, shape index: {}]   ;;  %s4145_s3 = inlined_call_operand.hbm [shape: bf16[2,128,128], index: 3, kind: input, shape index: {}]   ;;  %s4146_s4 = inlined_call_operand.vmem [shape: f32[2,1,128], index: 4, kind: input, shape index: {}]   ;;  %s4147_s5 = inlined_call_operand.hbm [shape: bf16[2,128,256], index: 5, kind: input, shape index: {}]   ;;  %s4148_s6 = inlined_call_operand.vmem [shape: f32[2,1,256], index: 6, kind: input, shape index: {}]   ;;  %s4149_s7 = inlined_call_operand.hbm [shape: bf16[2,256,128], index: 7, kind: input, shape index: {}]   ;;  %s4150_s8 = inlined_call_operand.vmem [shape: f32[2,1,128], index: 8, kind: input, shape index: {}]   ;;  %s4151_s9 = inlined_call_operand.vmem [shape: f32[2,1,128], index: 9, kind: input, shape index: {}]   ;;  %s4152_s10 = inlined_call_operand.vmem [shape: f32[2,1,128], index: 10, kind: input, shape index: {}]   ;;  %s4153_s11 = inlined_call_operand.vmem [shape: f32[2,1,128], index: 11, kind: input, shape index: {}]   ;;  %s4154_s12 = inlined_call_operand.vmem [shape: f32[2,1,128], index: 12, kind: input, shape index: {}]   ;;  %s4155_s13 = inlined_call_operand.hbm [shape: f32[16,128], index: 13, kind: output, shape index: {}]  }
   0x1   :  { %4162 = sst [smem:[#allocation21_spill]] %s4142_s0 }
   0x2   :  { %4163 = sst [smem:[#allocation22_spill]] %s4143_s1 }
   0x3   :  { %4164 = sst [smem:[#allocation23_spill]] %s4144_s2 }
   0x4   :  { %4165 = sst [smem:[#allocation24_spill]] %s4145_s3 }
   0x5   :  { %4166 = sst [smem:[#allocation25_spill]] %s4147_s5 }
   0x6   :  { %4167 = sst [smem:[#allocation26_spill]] %s4148_s6 }
   0x7   :  { %4168 = sst [smem:[#allocation27_spill]] %s4149_s7 }
   0x8   :  { %4169 = sst [smem:[#allocation28_spill]] %s4150_s8 }
   0x9   :  { %4170 = sst [smem:[#allocation29_spill]] %s4151_s9 }
   0xa   :  { %4171 = sst [smem:[#allocation30_spill]] %s4152_s10 }
   0xb   :  { %4172 = sst [smem:[#allocation31_spill]] %s4153_s11 }
   0xc   :  { %4173 = sst [smem:[#allocation32_spill]] %s4154_s12 }
   0xd   :  { %4174 = sst [smem:[#allocation33_spill]] %s4155_s13 }
   0xe   :  { %18 = vsyncpa [#allocation4], 0 }
   0xf   :  { %19 = vsyncpa [#allocation7], 0 }
  0x10   :  { %20 = vsyncpa [#allocation5], 0  ;;  %s3597_s25 = smov 0   ;;  %s3599_s26 = smov 0  }
  0x11   :  { %s3601_s27 = smov 0   ;;  %s3603_s28 = smov 0  }
  0x12   :  { %s3605_s29 = smov 0   ;;  %s3607_s30 = smov 0  }
  0x13 LB: > { %4175 = sst [smem:[#allocation17_spill]] %s3490_s27  ;;  %s3626_s14 = sadd.s32 4294967295, %s3502_s30   ;;  %s3502_s30 = sphi %s3607_s30, %s26_s30   ;;  %s3498_s29 = sphi %s3605_s29, %s4216_s29   ;;  %s3494_s28 = sphi %s3603_s28, %s4215_s28   ;;  %s3490_s27 = sphi %s3601_s27, %s4211_s27   ;;  %s3486_s26 = sphi %s3599_s26, %s4214_s26   ;;  %s3482_s25 = sphi %s3597_s25, %s4213_s25  }
  0x14   : > { %4176 = sst [smem:[#allocation18_spill]] %s3502_s30  ;;  %p104_p0 = scmp.ne.s32.totalorder %s3490_s27, %s3486_s26 }
  0x15   : > { %p105_p1 = scmp.eq.s32.totalorder %s3502_s30, 0  ;;  %p110_p2 = scmp.ne.s32.totalorder %s3486_s26, %s3482_s25 }
  0x16   : > { %p4156_p3 = scmp.eq.s32.totalorder %s3626_s14, 0  ;;  %p2689_p5 = scmp.ge.s32.totalorder %s3502_s30, 1 }
  0x17   : > { %p106_p4 = por %p105_p1, %p104_p0  ;;  %p407_p7 = scmp.lt.s32.totalorder %s3502_s30, 3 }
  0x18   : > { %p3637_p6 = por %p4156_p3, %p110_p2  ;;  %s3504_s18 = smov [#allocation3]  }
  0x19   : > { %p3642_p8 = pnand %p2689_p5, %p407_p7  ;;  %s422_s19 = sshll.u32 %s3504_s18, 4  ;;  %s423_s19 = int_to_ptr.vmem [resolvable:$true] %s422_s19 }
  0x1a   : > { %p3060_p10 = scmp.lt.s32.totalorder %s3502_s30, 2  ;;  %s35_s22 = sadd.s32 1, %s3498_s29 }
  0x1b   : > { %p3038_p9 = pneg %p3642_p8  ;;  %s3263_s23 = scalar_lea.vmem %s423_s19, 256 }
  0x1c   : > { %p3655_p12 = pnand %p3060_p10, %p106_p4  ;;  %p3264_p0 = scmp.ne.s32.totalorder %s423_s19, %s3263_s23 }
  0x1d   : > { %p3651_p11 = pnand %p3038_p9, %p4156_p3  ;;  %p3271_p5 = scmp.lt.s32.totalorder %s423_s19, %s423_s19 }
  0x1e   : > { %p3272_p7 = scmp.lt.s32.totalorder %s3263_s23, %s3263_s23 }
  0x1f   : > { %p3254_p13 = pneg %p3651_p11 }
  0x20   : > { %p3273_p9 = por %p3272_p7, %p3271_p5 }
  0x21   : > { %p3266_p1 = pnand %p3264_p0, %p3254_p13 }
  0x23   : > { %p3267_p2 = pneg %p3266_p1 }
  0x25   : > { %p3274_p3 = pnand %p3273_p9, %p3267_p2 }
  0x27   : > { %3277 = shalt.err (!%p3274_p3)
}
  0x28   : > { %s4157_s24 = smov 128   ;;  %s4158_s25 = smov 8  }
  0x29   : > { %s4181_s0 = sld [smem:[#allocation21_spill]]  ;;  %p36_p4 = scmp.ge.s32.totalorder %s35_s22, 2 }
  0x2a   : > { %s452_s23 = sand.u32 1, %s3502_s30   ;;  %s3675_s13 = sand.u32 1, %s3490_s27  }
  0x2b   : > { %s4218_s22 = smov (%p36_p4, %s35_s22), 0  ;;  %s3015_s12 = smul.u32 192, %s3675_s13 }
  0x2c   : > { %4182 = sst [smem:[#allocation19_spill]] %s4218_s22  ;;  %s94_s11 = ssub.s32 %s3498_s29, %s4218_s22 }
  0x2d   : > { %s3016_s10 = smul.u32 3072, %s3498_s29  ;;  %p95_p3 = scmp.eq.s32.totalorder %s94_s11, 0 }
  0x2e   : > { %s4183_s2 = sld [smem:[#allocation23_spill]]  ;;  %s3692_s30 = scalar_lea.sflag [#allocation4], %s452_s23 }
  0x2f   : > { %3041 = dma.hbm_to_vmem [thread:$0]  (!%p3651_p11), %s4181_s0, 256, %s423_s19, [#allocation4], %s4157_s24, %s4157_s24, %s4158_s25  }
  0x30   : > { %s456_s19 = scalar_lea.vmem [#allocation8], %s3015_s12  ;;  %s4184_s24 = sadd.s32 1, %s3490_s27 }
  0x31   : > { %s463_s18 = sshll.u32 %s456_s19, 4  ;;  %s2694_s0 = sshll.u32 %s3675_s13, 6  ;;  %s464_s18 = int_to_ptr.vmem [resolvable:$true] %s463_s18 }
  0x32   : > { %s3689_s25 = scalar_select %p95_p3, %s3490_s27, %s4184_s24  }
  0x33   : > { %p3280_p10 = pneg %p3655_p12  ;;  %s3291_s6 = scalar_lea.vmem %s464_s18, 3072 }
  0x34   : > { %s462_s15 = scalar_lea.hbm %s4183_s2, %s3016_s10  ;;  %4185 = sst [smem:[#allocation20_spill]] %s3689_s25 }
  0x35   : > { %p3292_p0 = scmp.ne.s32.totalorder %s464_s18, %s3291_s6  ;;  %s3507_s11 = smov [#allocation8]  }
  0x36   : > { %s3296_s8 = sshll.u32 %s3507_s11, 4  ;;  %s3297_s8 = int_to_ptr.vmem [resolvable:$false] %s3296_s8 }
  0x37   : > { %p3294_p1 = pnand %p3292_p0, %p3280_p10  ;;  %s3298_s9 = scalar_lea.vmem %s3297_s8, 6144 }
  0x38   : > { %p3299_p5 = scmp.lt.s32.totalorder %s464_s18, %s3297_s8  ;;  %p3300_p7 = scmp.lt.s32.totalorder %s3298_s9, %s3291_s6 }
  0x39   : > { %p3295_p2 = pneg %p3294_p1 }
  0x3a   : > { %p3301_p9 = por %p3300_p7, %p3299_p5 }
  0x3c   : > { %p3302_p4 = pnand %p3301_p9, %p3295_p2 }
  0x3e   : > { %3305 = shalt.err (!%p3302_p4)
}
  0x3f   : > { %s3508_s10 = smov 192   ;;  %s3509_s12 = smov 12  }
  0x40   : > { %3048 = dma.hbm_to_vmem [thread:$0]  (!%p3655_p12), %s462_s15, 3072, %s464_s18, %s3692_s30, %s3508_s10, %s3508_s10, %s3509_s12  }
  0x41   : > { %s2804_s24 = sshll.u32 %s3498_s29, 10  ;;  %s4186_s3 = sld [smem:[#allocation24_spill]] }
  0x42   : > { %s477_s2 = scalar_lea.vmem [#allocation9], %s2694_s0  ;;  %s2697_s6 = sshll.u32 %s3675_s13, 7 }
  0x43   : > { %s484_s8 = sshll.u32 %s477_s2, 4  ;;  %s3510_s22 = smov [#allocation9]   ;;  %s485_s8 = int_to_ptr.vmem [resolvable:$true] %s484_s8 }
  0x44   : > { %s3319_s9 = scalar_lea.vmem %s485_s8, 1024  ;;  %s3324_s25 = sshll.u32 %s3510_s22, 4  ;;  %s3325_s25 = int_to_ptr.vmem [resolvable:$false] %s3324_s25 }
  0x45   : > { %p3320_p3 = scmp.ne.s32.totalorder %s485_s8, %s3319_s9  ;;  %s3326_s27 = scalar_lea.vmem %s3325_s25, 2048 }
  0x46   : > { %p3327_p2 = scmp.lt.s32.totalorder %s485_s8, %s3325_s25  ;;  %p3328_p5 = scmp.lt.s32.totalorder %s3326_s27, %s3319_s9 }
  0x47   : > { %s483_s11 = scalar_lea.hbm %s4186_s3, %s2804_s24  ;;  %p3322_p0 = pnand %p3320_p3, %p3280_p10 }
  0x48   : > { %p3329_p7 = por %p3328_p5, %p3327_p2 }
  0x49   : > { %p3323_p1 = pneg %p3322_p0 }
  0x4b   : > { %p3330_p9 = pnand %p3329_p7, %p3323_p1 }
  0x4d   : > { %3333 = shalt.err (!%p3330_p9)
}
  0x4e   : > { %s3511_s15 = smov 64   ;;  %s3512_s0 = smov 4  }
  0x4f   : > { %3051 = dma.hbm_to_vmem [thread:$0]  (!%p3655_p12), %s483_s11, 1024, %s485_s8, %s3692_s30, %s3511_s15, %s3511_s15, %s3512_s0  }
  0x50   : > { %s2805_s2 = sshll.u32 %s3498_s29, 11  ;;  %s4187_s5 = sld [smem:[#allocation25_spill]] }
  0x51   : > { %s504_s18 = scalar_lea.vmem [#allocation10], %s2697_s6  ;;  %s3513_s24 = smov [#allocation10]  }
  0x52   : > { %s511_s10 = sshll.u32 %s504_s18, 4  ;;  %s3352_s23 = sshll.u32 %s3513_s24, 4  ;;  %s512_s10 = int_to_ptr.vmem [resolvable:$true] %s511_s10  ;;  %s3353_s23 = int_to_ptr.vmem [resolvable:$false] %s3352_s23 }
  0x53   : > { %s3347_s12 = scalar_lea.vmem %s512_s10, 2048  ;;  %s3354_s19 = scalar_lea.vmem %s3353_s23, 4096 }
  0x54   : > { %p3348_p4 = scmp.ne.s32.totalorder %s512_s10, %s3347_s12  ;;  %p3355_p1 = scmp.lt.s32.totalorder %s512_s10, %s3353_s23 }
  0x55   : > { %p3356_p2 = scmp.lt.s32.totalorder %s3354_s19, %s3347_s12 }
  0x56   : > { %s510_s25 = scalar_lea.hbm %s4187_s5, %s2805_s2  ;;  %p3350_p3 = pnand %p3348_p4, %p3280_p10 }
  0x57   : > { %p3357_p5 = por %p3356_p2, %p3355_p1 }
  0x58   : > { %p3351_p0 = pneg %p3350_p3 }
  0x5a   : > { %p3358_p7 = pnand %p3357_p5, %p3351_p0 }
  0x5c   : > { %3361 = shalt.err (!%p3358_p7)
}
  0x5d   : > { %s4188_s11 = smov 8   ;;  %s4189_s8 = smov 128  }
  0x5e   : > { %3054 = dma.hbm_to_vmem [thread:$0]  (!%p3655_p12), %s510_s25, 2048, %s512_s10, %s3692_s30, %s4189_s8, %s4189_s8, %s4188_s11  }
  0x5f   : > { %s3514_s9 = smov [#allocation6]  }
  0x60   : > { %s438_s22 = sshll.u32 %s3514_s9, 4  ;;  %s439_s22 = int_to_ptr.vmem [resolvable:$true] %s438_s22 }
  0x61   : > { %s3373_s27 = scalar_lea.vmem %s439_s22, 32  ;;  %p3381_p1 = scmp.lt.s32.totalorder %s439_s22, %s439_s22 }
  0x62   : > { %p3374_p9 = scmp.ne.s32.totalorder %s439_s22, %s3373_s27  ;;  %p3382_p0 = scmp.lt.s32.totalorder %s3373_s27, %s3373_s27 }
  0x64   : > { %p3376_p4 = pnand %p3374_p9, %p3254_p13  ;;  %p3383_p2 = por %p3382_p0, %p3381_p1 }
  0x66   : > { %p3377_p3 = pneg %p3376_p4 }
  0x68   : > { %p3384_p5 = pnand %p3383_p2, %p3377_p3 }
  0x6a   : > { %3387 = shalt.err (!%p3384_p5)
}
  0x6b   : > { %s3515_s18 = smov 16   ;;  %s3516_s25 = smov 1  }
  0x6c   : > { %s4190_s1 = sld [smem:[#allocation22_spill]]  ;;  %s532_s11 = scalar_lea.vmem [#allocation11], %s2697_s6 }
  0x6d   : > { %s4191_s7 = sld [smem:[#allocation27_spill]]  ;;  %s539_s8 = sshll.u32 %s532_s11, 4  ;;  %s540_s8 = int_to_ptr.vmem [resolvable:$true] %s539_s8 }
  0x6e   : > { %s3401_s9 = scalar_lea.vmem %s540_s8, 2048  ;;  %s3517_s20 = smov [#allocation11]  }
  0x6f   : > { %p3402_p13 = scmp.ne.s32.totalorder %s540_s8, %s3401_s9  ;;  %s3406_s27 = sshll.u32 %s3517_s20, 4  ;;  %s3407_s27 = int_to_ptr.vmem [resolvable:$false] %s3406_s27 }
  0x70   : > { %s3408_s10 = scalar_lea.vmem %s3407_s27, 4096 }
  0x71   : > { %p3404_p7 = pnand %p3402_p13, %p3280_p10  ;;  %p3410_p4 = scmp.lt.s32.totalorder %s3408_s10, %s3401_s9 }
  0x72   : > { %3044 = dma.hbm_to_vmem [thread:$0]  (!%p3651_p11), %s4190_s1, 32, %s439_s22, [#allocation7], %s3515_s18, %s3515_s18, %s3516_s25  }
  0x73   : > { %s538_s19 = scalar_lea.hbm %s4191_s7, %s2805_s2  ;;  %p3405_p9 = pneg %p3404_p7 }
  0x74   : > { %p3409_p11 = scmp.lt.s32.totalorder %s540_s8, %s3407_s27 }
  0x76   : > { %p3411_p3 = por %p3410_p4, %p3409_p11 }
  0x78   : > { %p3412_p1 = pnand %p3411_p3, %p3405_p9 }
  0x7a   : > { %3415 = shalt.err (!%p3412_p1)
}
  0x7b   : > { %3057 = dma.hbm_to_vmem [thread:$0]  (!%p3655_p12), %s538_s19, 2048, %s540_s8, %s3692_s30, %s3511_s15, %s3511_s15, %s3512_s0  }
  0x7c   : > { %581 = sbr.rel (%p3642_p8) target bundleno = 2389 (0x955), region = 72  ;;  %p4192_p10 = scmp.eq.s32.totalorder (!%p3642_p8), %s3626_s14, 0 }
  0x81   : > { %3465 = dma.done.wait (%p4192_p10), [#allocation4], 256   ;;  %p4193_p0 = pmov %p4192_p10 }
  0x83   : > { %3467 = vsyncadd (%p4193_p0), [#allocation4], 4294967040  ;;  %p4194_p2 = pmov %p4193_p0 }
  0x84   : > { %p4195_p5 = pmov %p4193_p0 }
  0x85   : > { %3469 = dma.done.wait (%p4194_p2), [#allocation7], 32  }
  0x86   : > { %3471 = vsyncadd (%p4195_p5), [#allocation7], 4294967264  ;;  %s591_s13 = sand.u32 1, %s3626_s14   ;;  %s593_s30 = sand.u32 1, %s3486_s26  }
  0x87   : > { %s3017_s21 = smul.u32 192, %s593_s30  ;;  %s592_s17 = scalar_lea.sflag [#allocation4], %s591_s13 }
  0x89   : > { %s3769_s6 = scalar_lea.vmem [#allocation8], %s3017_s21 }
  0x8a   : > { %3473 = dma.done.wait (%p3637_p6), %s592_s17, 8192  }
  0x8b   : > { %3475 = vsyncadd (%p3637_p6), %s592_s17, 4294959104  ;;  %s2706_s15 = sshll.u32 %s593_s30, 6  ;;  %s2707_s0 = sshll.u32 %s593_s30, 7 }
  0x8c   : > { %p699_p8 = scmp.lt.s32.totalorder %s3494_s28, 1  ;;  %s4196_s23 = sld [smem:[#allocation26_spill]] }
  0x8d   : > { %s4197_s9 = sld [smem:[#allocation28_spill]]  ;;  %s3811_s11 = scalar_lea.vmem [#allocation10], %s2707_s0 }
  0x8e   : > { %s3777_s2 = scalar_select %p699_p8, %s3494_s28, 1 }
  0x8f   : > { %s4198_s13 = sld [smem:[#allocation29_spill]]  ;;  %s3813_s8 = scalar_lea.vmem [#allocation11], %s2707_s0 }
  0x90   : > { %s2709_s16 = sshll.u32 %s3777_s2, 1  ;;  %s4199_s22 = sld [smem:[#allocation30_spill]] }
  0x91   : > { %s4200_s3 = sld [smem:[#allocation31_spill]]  ;;  %p2710_p6 = scmp.ne.s32.totalorder %s3494_s28, 0 }
  0x92   : > { %s3787_s19 = scalar_lea.vmem %s4196_s23, %s2709_s16  ;;  %s4201_s16 = sld [smem:[#allocation32_spill]] }
  0x93   : > { %s708_s20 = scalar_lea.vmem %s4197_s9, %s3777_s2  ;;  %s3809_s23 = scalar_lea.vmem [#allocation9], %s2706_s15 }
  0x94   : > { %726 = sbr.rel (%p2710_p6) target bundleno = 155 (0x9b), region = 100 }
  0x95   : > { %s711_s30 = scalar_lea.vmem %s4198_s13, %s3777_s2 }
  0x96   : > { %s714_s18 = scalar_lea.vmem %s4199_s22, %s3777_s2 }
  0x97   : > { %s717_s5 = scalar_lea.vmem %s4200_s3, %s3777_s2 }
  0x98   : > { %s720_s24 = scalar_lea.vmem %s4201_s16, %s3777_s2 }
  0x99   : > { %v727_v0 = vld [vmem:[#allocation3] sm:$0xff]  ;;  %v728_v1 = vld [vmem:[#allocation3 + $0x8] sm:$0xff] }
  0x9a   : > { %729 = vst [vmem:[#allocation2] sm:$0xff] %v727_v0  ;;  %730 = vst [vmem:[#allocation2 + $0x8] sm:$0xff] %v728_v1 }
  0x9b PF: > { %v3132_v2 = vld [vmem:[%s3769_s6 + $0xac] ss:$12 sps:$4 sm:$0xff]   ;;  %v3134_v3 = vld [vmem:[%s3769_s6 + $0xa8] ss:$12 sps:$4 sm:$0xff]   ;;  %v3518_v4 = vmov 0   ;;  %v3519_v5 = vmov 0.0   ;;  %s4202_s0 = scalar_lea.vmem %s4146_s4, %s3777_s2 }
  0x9c   : > { %928 = vmatprep.mubr.bf16.mxu0 %v3518_v4  ;;  %2879 = vmatprep.subr.bf16.mxu1 %v3519_v5  ;;  %v3135_v6 = vld [vmem:[%s3769_s6 + $0x94] ss:$12 sps:$4 sm:$0xff]   ;;  %v3137_v7 = vld [vmem:[%s3769_s6 + $0x90] ss:$12 sps:$4 sm:$0xff]   ;;  %v3140_v9 = vld [vmem:[%s3769_s6 + $0x78] ss:$12 sps:$4 sm:$0xff]  }
  0x9d   : > { %896 = vmatprep.subr.bf16.mxu0 %v3132_v2  ;;  %v3138_v8 = vld [vmem:[%s3769_s6 + $0x7c] ss:$12 sps:$4 sm:$0xff]   ;;  %v3141_v10 = vld [vmem:[%s3769_s6 + $0x64] ss:$12 sps:$4 sm:$0xff]   ;;  %v3143_v11 = vld [vmem:[%s3769_s6 + $0x60] ss:$12 sps:$4 sm:$0xff]  }
  0x9e   : > { %897 = vmatpush1.bf16.msra.mxu0 %v3134_v3  ;;  %v3144_v12 = vld [vmem:[%s3769_s6 + $0x4c] ss:$12 sps:$4 sm:$0xff]   ;;  %v3156_v13 = vld [vmem:[%s3769_s6 + $0xb0] ss:$12 sps:$4 sm:$0xff]   ;;  %v3146_v15 = vld [vmem:[%s3769_s6 + $0x48] ss:$12 sps:$4 sm:$0xff]  }
  0x9f   : > { %898 = vmatprep.subr.bf16.mxu0 %v3135_v6  ;;  %2880 = vmatpush3.bf16.msra.mxu1 %v3156_v13  ;;  %v3157_v14 = vld [vmem:[%s3769_s6 + $0x98] ss:$12 sps:$4 sm:$0xff]   ;;  %v3147_v16 = vld [vmem:[%s3769_s6 + $0x34] ss:$12 sps:$4 sm:$0xff]   ;;  %v3149_v17 = vld [vmem:[%s3769_s6 + $0x30] ss:$12 sps:$4 sm:$0xff]  }
  0xa0   : > { %2881 = vmatprep.subr.bf16.mxu1 %v3519_v5  ;;  %v3158_v18 = vld [vmem:[%s3769_s6 + $0x80] ss:$12 sps:$4 sm:$0xff]   ;;  %v3150_v19 = vld [vmem:[%s3769_s6 + $0x1c] ss:$12 sps:$4 sm:$0xff]   ;;  %v3152_v21 = vld [vmem:[%s3769_s6 + $0x18] ss:$12 sps:$4 sm:$0xff]  }
  0xa1   : > { %v3159_v20 = vld [vmem:[%s3769_s6 + $0x68] ss:$12 sps:$4 sm:$0xff]   ;;  %v3153_v22 = vld [vmem:[%s3769_s6 + $0x4] ss:$12 sps:$4 sm:$0xff]   ;;  %v3155_v24 = vld [vmem:[%s3769_s6] ss:$12 sps:$4 sm:$0xff]  }
  0xa2   : > { %899 = vmatpush1.bf16.msra.mxu0 %v3137_v7  ;;  %v3160_v23 = vld [vmem:[%s3769_s6 + $0x50] ss:$12 sps:$4 sm:$0xff]   ;;  %v3844_v26 = vld [vmem:[#allocation2 + $0x8] sm:$0xff]  ;;  %vm3520_vm0 = vmmov 0   ;;  %vm1037_vm1 = vcmask 261120   ;;  %s3521_s1 = smov 64  }
  0xa3   : > { %900 = vmatprep.subr.bf16.mxu0 %v3138_v8  ;;  %2882 = vmatpush3.bf16.msra.mxu1 %v3157_v14  ;;  %v3842_v25 = vld [vmem:[#allocation2] sm:$0xff]  ;;  %v3163_v30 = vld [vmem:[%s3769_s6 + $0x8] ss:$12 sps:$4 sm:$0xff]   ;;  %s3522_s3 = smov 96   ;;  %s3523_s7 = smov 32   ;;  %vm1506_vm2 = vcmask 1043456  }
  0xa4   : > { %2883 = vmatprep.subr.bf16.mxu1 %v3519_v5  ;;  %v3161_v27 = vld [vmem:[%s3769_s6 + $0x38] ss:$12 sps:$4 sm:$0xff]   ;;  %v735_v28 = vpack.c.bf16 %v3844_v26, %v3842_v25  ;;  %v3162_v29 = vld [vmem:[%s3769_s6 + $0x20] ss:$12 sps:$4 sm:$0xff]   ;;  %2895 = vmatprep.mubr.msk.bf16.mxu1 %vm3520_vm0, %v3519_v5  ;;  %v2735_v1 = vld [vmem:[#allocation6] ss:$0 sm:$0xff] }
  0xa5   : > { %vm1406_vm3 = vcmask 64512   ;;  %v2736_v14 = vld [vmem:[#allocation6 + $0x1] ss:$0 sm:$0xff]  ;;  %vm1892_vm4 = vcmask 523264   ;;  %vm1895_vm5 = vcmask 785408   ;;  %p2799_p12 = scmp.ne.s32.totalorder %s3494_s28, 1 }
  0xa6   : > { %901 = vmatpush1.bf16.msra.mxu0 %v3140_v9 }
  0xa7   : > { %902 = vmatprep.subr.bf16.mxu0 %v3141_v10  ;;  %2884 = vmatpush3.bf16.msra.mxu1 %v3158_v18 }
  0xa8   : > { %2885 = vmatprep.subr.bf16.mxu1 %v3519_v5 }
  0xaa   : > { %903 = vmatpush1.bf16.msra.mxu0 %v3143_v11 }
  0xab   : > { %904 = vmatprep.subr.bf16.mxu0 %v3144_v12  ;;  %2886 = vmatpush3.bf16.msra.mxu1 %v3159_v20 }
  0xac   : > { %2887 = vmatprep.subr.bf16.mxu1 %v3519_v5 }
  0xae   : > { %905 = vmatpush1.bf16.msra.mxu0 %v3146_v15 }
  0xaf   : > { %906 = vmatprep.subr.bf16.mxu0 %v3147_v16  ;;  %2888 = vmatpush3.bf16.msra.mxu1 %v3160_v23 }
  0xb0   : > { %2889 = vmatprep.subr.bf16.mxu1 %v3519_v5 }
  0xb2   : > { %907 = vmatpush1.bf16.msra.mxu0 %v3149_v17 }
  0xb3   : > { %908 = vmatprep.subr.bf16.mxu0 %v3150_v19  ;;  %2890 = vmatpush3.bf16.msra.mxu1 %v3161_v27 }
  0xb4   : > { %2891 = vmatprep.subr.bf16.mxu1 %v3519_v5 }
  0xb6   : > { %909 = vmatpush1.bf16.msra.mxu0 %v3152_v21 }
  0xb7   : > { %910 = vmatprep.subr.bf16.mxu0 %v3153_v22  ;;  %2892 = vmatpush3.bf16.msra.mxu1 %v3162_v29 }
  0xb8   : > { %2893 = vmatprep.subr.bf16.mxu1 %v3519_v5 }
  0xba   : > { %911 = vmatpush1.bf16.msra.mxu0 %v3155_v24 }
  0xbb   : > { %2923 = vmatprep.subr.bf16.mxu0 %v3519_v5  ;;  %2894 = vmatpush3.bf16.msra.mxu1 %v3163_v30 }
  0xbc   : > { %2899 = vmatprep.subr.bf16.mxu1 %v3519_v5 }
  0xbd   : > { %929 = vmatmul.mubr.bf16.vlgmr.msra.gmra.mxu0 %v735_v28 }
  0xbe   : > { %2925 = vmatprep.mubr.msk.bf16.mxu0 %vm3520_vm0, %v3519_v5  ;;  %2896 = vmatmul.mubr.bf16.vlgmr.msra.gmra.mxu1 %v735_v28 }
  0xbf   : > { %2901 = vmatprep.mubr.msk.bf16.mxu1 %vm3520_vm0, %v3519_v5 }
 0x17d   : > { %v930_v31 = vpop.f32.mrf.mxu0 }
 0x17e   : > { %v973_v41 = vpop.f32.mrf.mxu1 }
 0x17f   : > { %v932_v32 = vpop.f32.mrf.mxu0 }
 0x180   : > { %v2897_v42 = vpop.f32.mrf.mxu1 }
 0x181   : > { %v934_v33 = vpop.f32.mrf.mxu0 }
 0x182   : > { %v980_v38 = vpack.c.bf16 %v934_v33, %v930_v31  ;;  %v976_v43 = vpop.f32.mrf.mxu1 }
 0x183   : > { %v936_v34 = vpop.f32.mrf.mxu0  ;;  %v3885_v44 = vpack.c.bf16 %v976_v43, %v973_v41 }
 0x184   : > { %v981_v35 = vpack.c.bf16 %v936_v34, %v932_v32  ;;  %v990_v40 = vrot.slane %v980_v38, 4  ;;  %v2898_v45 = vpop.f32.mrf.mxu1 }
 0x185   : > { %v1508_v59 = vsel %vm1506_vm2, %v3885_v44, 0 }
 0x186   : > { %1000 = vrot.lane.b32.xlu1 %v981_v35, %s3521_s1  ;;  %998 = vrot.lane.b32.xlu0 %v981_v35, %s3522_s3  ;;  %v1042_v36 = vsel %vm1037_vm1, %v981_v35, 0  ;;  %v1004_v37 = vrot.slane %v981_v35, 4 }
 0x187   : > { %2900 = vmatpush3.bf16.xpose.msra.mxu1 %v1042_v36 }
 0x188   : > { %v1226_v39 = vsel %vm1037_vm1, %v1004_v37, 0  ;;  %2905 = vmatprep.subr.bf16.mxu1 %v3519_v5 }
 0x189   : > { %2924 = vmatpush3.bf16.xpose.msra.mxu0 %v1226_v39 }
 0x18a   : > { %986 = vrot.lane.b32.xlu1 %v980_v38, %s3521_s1  ;;  %984 = vrot.lane.b32.xlu0 %v980_v38, %s3522_s3 }
 0x18b   : > { %2935 = vmatprep.subr.bf16.mxu0 %v3519_v5 }
 0x18e   : > { %988 = vrot.lane.b32.xlu1 %v980_v38, %s3523_s7  ;;  %1002 = vrot.lane.b32.xlu0 %v981_v35, %s3523_s7 }
 0x18f   : > { %2902 = vmatmul.mubr.msk.bf16.vlgmr.msra.gmra.mxu1 %vm1037_vm1, %v980_v38 }
 0x190   : > { %2926 = vmatmul.mubr.msk.bf16.vlgmr.msra.gmra.mxu0 %vm1037_vm1, %v990_v40  ;;  %2907 = vmatprep.mubr.msk.bf16.mxu1 %vm3520_vm0, %v3519_v5 }
 0x191   : > { %2937 = vmatprep.mubr.msk.bf16.mxu0 %vm3520_vm0, %v3519_v5 }
 0x192   : > { %1007 = vrot.lane.b32.xlu1 %v1004_v37, %s3521_s1  ;;  %1005 = vrot.lane.b32.xlu0 %v1004_v37, %s3522_s3 }
 0x196   : > { %1009 = vrot.lane.b32.xlu1 %v1004_v37, %s3523_s7  ;;  %991 = vrot.lane.b32.xlu0 %v990_v40, %s3522_s3 }
 0x19a   : > { %995 = vrot.lane.b32.xlu1 %v990_v40, %s3523_s7  ;;  %993 = vrot.lane.b32.xlu0 %v990_v40, %s3521_s1 }
 0x1f8   : > { %v1001_v46 = vpop.permute.xlu1 %1000  ;;  %v999_v47 = vpop.permute.xlu0 %998 }
 0x1f9   : > { %v1088_v48 = vsel %vm1037_vm1, %v999_v47, 0  ;;  %v1134_v53 = vsel %vm1037_vm1, %v1001_v46, 0 }
 0x1fa   : > { %2906 = vmatpush3.bf16.xpose.msra.mxu1 %v1088_v48 }
 0x1fb   : > { %2911 = vmatprep.subr.bf16.mxu1 %v3519_v5 }
 0x1fc   : > { %v987_v49 = vpop.permute.xlu1 %986  ;;  %v985_v50 = vpop.permute.xlu0 %984 }
 0x200   : > { %v989_v51 = vpop.permute.xlu1 %988  ;;  %v1003_v52 = vpop.permute.xlu0 %1002 }
 0x201   : > { %2908 = vmatmul.mubr.msk.bf16.vlgmr.msra.gmra.mxu1 %vm1037_vm1, %v985_v50  ;;  %v1180_v58 = vsel %vm1037_vm1, %v1003_v52, 0 }
 0x202   : > { %2912 = vmatpush3.bf16.xpose.msra.mxu1 %v1134_v53  ;;  %2913 = vmatprep.mubr.msk.bf16.mxu1 %vm3520_vm0, %v3519_v5 }
 0x203   : > { %2917 = vmatprep.subr.bf16.mxu1 %v3519_v5 }
 0x204   : > { %v1008_v54 = vpop.permute.xlu1 %1007  ;;  %v1006_v55 = vpop.permute.xlu0 %1005 }
 0x205   : > { %v1318_v56 = vsel %vm1037_vm1, %v1008_v54, 0  ;;  %v1272_v61 = vsel %vm1037_vm1, %v1006_v55, 0 }
 0x206   : > { %2936 = vmatpush3.bf16.xpose.msra.mxu0 %v1318_v56 }
 0x207   : > { %2947 = vmatprep.subr.bf16.mxu0 %v3519_v5 }
 0x208   : > { %v992_v57 = vpop.permute.xlu0 %991  ;;  %v1010_v62 = vpop.permute.xlu1 %1009 }
 0x209   : > { %2914 = vmatmul.mubr.msk.bf16.vlgmr.msra.gmra.mxu1 %vm1037_vm1, %v987_v49  ;;  %v1364_v63 = vsel %vm1037_vm1, %v1010_v62, 0 }
 0x20a   : > { %2918 = vmatpush3.bf16.xpose.msra.mxu1 %v1180_v58  ;;  %2919 = vmatprep.mubr.msk.bf16.mxu1 %vm3520_vm0, %v3519_v5 }
 0x20b   : > { %2929 = vmatprep.subr.bf16.mxu1 %v3519_v5 }
 0x20c   : > { %v994_v60 = vpop.permute.xlu0 %993  ;;  %v996_v0 = vpop.permute.xlu1 %995 }
 0x20d   : > { %2938 = vmatmul.mubr.msk.bf16.vlgmr.msra.gmra.mxu0 %vm1037_vm1, %v994_v60 }
 0x20e   : > { %2948 = vmatpush3.bf16.msra.mxu0 %v1508_v59  ;;  %2949 = vmatprep.mubr.msk.bf16.mxu0 %vm3520_vm0, %v3519_v5 }
 0x20f   : > { %2959 = vmatprep.subr.bf16.mxu0 %v3519_v5 }
 0x211   : > { %2920 = vmatmul.mubr.msk.bf16.vlgmr.msra.gmra.mxu1 %vm1037_vm1, %v989_v51 }
 0x212   : > { %2930 = vmatpush3.bf16.xpose.msra.mxu1 %v1272_v61  ;;  %2931 = vmatprep.mubr.msk.bf16.mxu1 %vm3520_vm0, %v3519_v5 }
 0x213   : > { %2941 = vmatprep.subr.bf16.mxu1 %v3519_v5 }
 0x219   : > { %2932 = vmatmul.mubr.msk.bf16.vlgmr.msra.gmra.mxu1 %vm1037_vm1, %v992_v57 }
 0x21a   : > { %2942 = vmatpush3.bf16.xpose.msra.mxu1 %v1364_v63  ;;  %2943 = vmatprep.mubr.msk.bf16.mxu1 %vm3520_vm0, %v3519_v5 }
 0x21b   : > { %2953 = vmatprep.subr.bf16.mxu1 %v3519_v5 }
 0x221   : > { %2944 = vmatmul.mubr.msk.bf16.vlgmr.msra.gmra.mxu1 %vm1037_vm1, %v996_v0 }
 0x222   : > { %2955 = vmatprep.mubr.msk.bf16.mxu1 %vm3520_vm0, %v3519_v5 }
 0x24f   : > { %v1078_v2 = vpop.f32.mrf.mxu1 }
 0x250   : > { %v1079_v3 = vadd.f32 %v2735_v1, %v1078_v2  ;;  %v1262_v6 = vpop.f32.mrf.mxu0 }
 0x251   : > { %v2903_v7 = vpop.f32.mrf.mxu1  ;;  %v1263_v18 = vadd.f32 %v2736_v14, %v1262_v6 }
 0x252   : > { %v1407_v8 = vsel %vm1406_vm3, %v1079_v3, -inf  ;;  %v2927_v9 = vpop.f32.mrf.mxu0 }
 0x253   : > { %v1081_v10 = vpop.f32.mrf.mxu1  ;;  %1408 = vmax.xlane.f32.xlu0 %v1407_v8  ;;  %v1419_v22 = vsel %vm1406_vm3, %v1263_v18, -inf }
 0x254   : > { %v1265_v11 = vpop.f32.mrf.mxu0 }
 0x255   : > { %v2904_v12 = vpop.f32.mrf.mxu1 }
 0x256   : > { %v2928_v13 = vpop.f32.mrf.mxu0 }
 0x2c1   : > { %v1124_v15 = vpop.f32.mrf.mxu1 }
 0x2c2   : > { %v1125_v16 = vadd.f32 %v2735_v1, %v1124_v15 }
 0x2c3   : > { %v2909_v17 = vpop.f32.mrf.mxu1 }
 0x2c4   : > { %v1410_v19 = vsel %vm1406_vm3, %v1125_v16, -inf }
 0x2c5   : > { %v1127_v20 = vpop.f32.mrf.mxu1  ;;  %1411 = vmax.xlane.f32.xlu1 %v1410_v19 }
 0x2c7   : > { %v2910_v21 = vpop.f32.mrf.mxu1 }
 0x2c9   : > { %v1170_v23 = vpop.f32.mrf.mxu1  ;;  %1420 = vmax.xlane.f32.xlu1 %v1419_v22 }
 0x2ca   : > { %v1171_v24 = vadd.f32 %v2735_v1, %v1170_v23 }
 0x2cb   : > { %v2915_v27 = vpop.f32.mrf.mxu1 }
 0x2cc   : > { %v1413_v28 = vsel %vm1406_vm3, %v1171_v24, -inf }
 0x2cd   : > { %v1173_v29 = vpop.f32.mrf.mxu1  ;;  %1414 = vmax.xlane.f32.xlu0 %v1413_v28  ;;  %v1354_v30 = vpop.f32.mrf.mxu0  ;;  %v1018_v28 = vrot.slane %v3885_v44, 4 }
 0x2ce   : > { %v1355_v31 = vadd.f32 %v2736_v14, %v1354_v30 }
 0x2cf   : > { %v2916_v32 = vpop.f32.mrf.mxu1  ;;  %v2939_v33 = vpop.f32.mrf.mxu0 }
 0x2d0   : > { %v1425_v34 = vsel %vm1406_vm3, %v1355_v31, -inf }
 0x2d1   : > { %v1216_v35 = vpop.f32.mrf.mxu1  ;;  %1426 = vmax.xlane.f32.xlu1 %v1425_v34  ;;  %v1357_v36 = vpop.f32.mrf.mxu0 }
 0x2d2   : > { %v1217_v37 = vadd.f32 %v2735_v1, %v1216_v35 }
 0x2d3   : > { %v2921_v38 = vpop.f32.mrf.mxu1  ;;  %v2940_v39 = vpop.f32.mrf.mxu0 }
 0x2d4   : > { %v1416_v40 = vsel %vm1406_vm3, %v1217_v37, -inf }
 0x2d5   : > { %v1219_v41 = vpop.f32.mrf.mxu1  ;;  %1417 = vmax.xlane.f32.xlu0 %v1416_v40 }
 0x2d7   : > { %v2922_v42 = vpop.f32.mrf.mxu1 }
 0x2d9   : > { %v1308_v43 = vpop.f32.mrf.mxu1 }
 0x2da   : > { %v3926_v45 = vadd.f32 %v2736_v14, %v1308_v43 }
 0x2db   : > { %v2933_v46 = vpop.f32.mrf.mxu1 }
 0x2dc   : > { %v1422_v47 = vsel %vm1406_vm3, %v3926_v45, -inf  ;;  %v1409_v56 = vpop.xlane.xlu0 %1408 }
 0x2dd   : > { %1423 = vmax.xlane.f32.xlu0 %v1422_v47  ;;  %v1311_v48 = vpop.f32.mrf.mxu1  ;;  %v1431_v57 = vsub.f32 %v1079_v3, %v1409_v56 }
 0x2df   : > { %v2934_v49 = vpop.f32.mrf.mxu1  ;;  %v1439_v58 = vmul.f32 1.442695, %v1431_v57 }
 0x2e1   : > { %v1400_v50 = vpop.f32.mrf.mxu1  ;;  %3212 = vpow2.f32 %v1439_v58 }
 0x2e2   : > { %v3930_v51 = vadd.f32 %v2736_v14, %v1400_v50  ;;  %1012 = vrot.lane.b32.xlu1 %v3885_v44, %s3522_s3 }
 0x2e3   : > { %v2945_v52 = vpop.f32.mrf.mxu1 }
 0x2e4   : > { %v1428_v53 = vsel %vm1406_vm3, %v3930_v51, -inf }
 0x2e5   : > { %1429 = vmax.xlane.f32.xlu0 %v1428_v53  ;;  %v1403_v54 = vpop.f32.mrf.mxu1 }
 0x2e7   : > { %v2946_v55 = vpop.f32.mrf.mxu1 }
 0x2ee   : > { %v3213_v59 = vpop.eup %3212 }
 0x2ef   : > { %v1455_v60 = vsel %vm1406_vm3, %v3213_v59, 0.0 }
 0x306   : > { %1456 = vadd.xlane.f32.xlu1 %v1455_v60 }
 0x34e   : > { %v1412_v61 = vpop.xlane.xlu1 %1411 }
 0x34f   : > { %v1432_v62 = vsub.f32 %v1125_v16, %v1412_v61 }
 0x351   : > { %v1441_v63 = vmul.f32 1.442695, %v1432_v62 }
 0x352   : > { %v1421_v0 = vpop.xlane.xlu1 %1420 }
 0x353   : > { %3214 = vpow2.f32 %v1441_v63  ;;  %v1435_v1 = vsub.f32 %v1263_v18, %v1421_v0  ;;  %v1692_v0 = vsel %vm1506_vm2, %v1018_v28, 0 }
 0x355   : > { %v1447_v2 = vmul.f32 1.442695, %v1435_v1 }
 0x356   : > { %v1415_v6 = vpop.xlane.xlu0 %1414 }
 0x357   : > { %3216 = vpow2.f32 %v1447_v2  ;;  %v1433_v7 = vsub.f32 %v1171_v24, %v1415_v6 }
 0x359   : > { %v1443_v10 = vmul.f32 1.442695, %v1433_v7 }
 0x35a   : > { %v1427_v8 = vpop.xlane.xlu1 %1426 }
 0x35b   : > { %v1437_v9 = vsub.f32 %v1355_v31, %v1427_v8 }
 0x35d   : > { %v1451_v3 = vmul.f32 1.442695, %v1437_v9 }
 0x35e   : > { %v1418_v11 = vpop.xlane.xlu0 %1417  ;;  %v1013_v12 = vpop.permute.xlu1 %1012 }
 0x35f   : > { %3218 = vpow2.f32 %v1451_v3  ;;  %v1434_v13 = vsub.f32 %v1217_v37, %v1418_v11  ;;  %v1554_v14 = vsel %vm1506_vm2, %v1013_v12, 0 }
 0x360   : > { %v3215_v15 = vpop.eup %3214  ;;  %2954 = vmatpush3.bf16.msra.mxu1 %v1554_v14  ;;  %3220 = vpow2.f32 %v1443_v10 }
 0x361   : > { %v1445_v16 = vmul.f32 1.442695, %v1434_v13  ;;  %v1458_v17 = vsel %vm1406_vm3, %v3215_v15, 0.0  ;;  %2965 = vmatprep.subr.bf16.mxu1 %v3519_v5 }
 0x362   : > { %1459 = vadd.xlane.f32.xlu0 %v1458_v17 }
 0x363   : > { %3222 = vpow2.f32 %v1445_v16 }
 0x364   : > { %v3940_v18 = vpop.eup %3216 }
 0x365   : > { %v1467_v19 = vsel %vm1406_vm3, %v3940_v18, 0.0 }
 0x366   : > { %1468 = vadd.xlane.f32.xlu1 %v1467_v19  ;;  %v1424_v29 = vpop.xlane.xlu0 %1423 }
 0x367   : > { %v1436_v30 = vsub.f32 %v3926_v45, %v1424_v29 }
 0x369   : > { %v1449_v33 = vmul.f32 1.442695, %v1436_v30 }
 0x36c   : > { %v3944_v20 = vpop.eup %3218 }
 0x36d   : > { %v1473_v21 = vsel %vm1406_vm3, %v3944_v20, 0.0  ;;  %v3221_v22 = vpop.eup %3220 }
 0x36e   : > { %1474 = vadd.xlane.f32.xlu1 %v1473_v21  ;;  %v1461_v27 = vsel %vm1406_vm3, %v3221_v22, 0.0  ;;  %v1430_v31 = vpop.xlane.xlu0 %1429 }
 0x36f   : > { %v1438_v34 = vsub.f32 %v3930_v51, %v1430_v31 }
 0x370   : > { %v3223_v23 = vpop.eup %3222 }
 0x371   : > { %v1464_v24 = vsel %vm1406_vm3, %v3223_v23, 0.0  ;;  %v1453_v35 = vmul.f32 1.442695, %v1438_v34 }
 0x372   : > { %1465 = vadd.xlane.f32.xlu0 %v1464_v24  ;;  %1462 = vadd.xlane.f32.xlu1 %v1461_v27  ;;  %v3164_v24 = vld [vmem:[%s3809_s23 + $0x38] sm:$0xff]   ;;  %v3165_v27 = vld [vmem:[%s3809_s23 + $0x30] sm:$0xff]  }
 0x383   : > { %1016 = vrot.lane.b32.xlu1 %v3885_v44, %s3523_s7 }
 0x387   : > { %1019 = vrot.lane.b32.xlu1 %v1018_v28, %s3522_s3 }
 0x388   : > { %1014 = vrot.lane.b32.xlu0 %v3885_v44, %s3521_s1 }
 0x38b   : > { %1023 = vrot.lane.b32.xlu1 %v1018_v28, %s3523_s7 }
 0x38f   : > { %v1457_v32 = vpop.xlane.xlu1 %1456 }
 0x390   : > { %3224 = vrcp.f32 %v1457_v32 }
 0x391   : > { %3226 = vpow2.f32 %v1449_v33 }
 0x392   : > { %3228 = vpow2.f32 %v1453_v35 }
 0x39d   : > { %v3225_v36 = vpop.eup %3224 }
 0x39e   : > { %v1487_v37 = vmul.f32 %v3225_v36, %v3213_v59  ;;  %v3960_v44 = vpop.eup %3226 }
 0x39f   : > { %v1470_v39 = vsel %vm1406_vm3, %v3960_v44, 0.0  ;;  %v3966_v40 = vpop.eup %3228 }
 0x3a0   : > { %v1495_v38 = vpack.c.bf16 %v1487_v37, %v1487_v37  ;;  %v1476_v41 = vsel %vm1406_vm3, %v3966_v40, 0.0 }
 0x3a2   : > { %2950 = vmatmul.mubr.msk.bf16.vlgmr.msra.gmra.mxu0 %vm1406_vm3, %v1495_v38 }
 0x3a3   : > { %2961 = vmatprep.mubr.msk.bf16.mxu0 %vm3520_vm0, %v3519_v5 }
 0x3a7   : > { %1471 = vadd.xlane.f32.xlu0 %v1470_v39 }
 0x3ab   : > { %1477 = vadd.xlane.f32.xlu0 %v1476_v41 }
 0x3c1   : > { %1021 = vrot.lane.b32.xlu0 %v1018_v28, %s3521_s1  ;;  %v3166_v28 = vld [vmem:[%s3809_s23 + $0x28] sm:$0xff]  }
 0x3eb   : > { %v1460_v42 = vpop.xlane.xlu0 %1459 }
 0x3ec   : > { %3230 = vrcp.f32 %v1460_v42 }
 0x3ef   : > { %v1469_v43 = vpop.xlane.xlu1 %1468 }
 0x3f7   : > { %v1475_v45 = vpop.xlane.xlu1 %1474 }
 0x3f9   : > { %v3231_v46 = vpop.eup %3230 }
 0x3fa   : > { %v1488_v47 = vmul.f32 %v3231_v46, %v3215_v15  ;;  %v3168_v46 = vld [vmem:[%s3809_s23 + $0x18] sm:$0xff]  }
 0x3fb   : > { %v1466_v48 = vpop.xlane.xlu0 %1465  ;;  %v1463_v49 = vpop.xlane.xlu1 %1462 }
 0x3fc   : > { %3232 = vrcp.f32 %v1466_v48  ;;  %v1496_v50 = vpack.c.bf16 %v1488_v47, %v1488_v47  ;;  %v3169_v47 = vld [vmem:[%s3809_s23 + $0x10] sm:$0xff]  }
 0x3fd   : > { %3234 = vrcp.f32 %v1463_v49  ;;  %v3170_v49 = vld [vmem:[%s3809_s23 + $0x8] sm:$0xff]  }
 0x3fe   : > { %2956 = vmatmul.mubr.msk.bf16.vlgmr.msra.gmra.mxu1 %vm1406_vm3, %v1496_v50  ;;  %3236 = vrcp.f32 %v1469_v43 }
 0x3ff   : > { %v1015_v51 = vpop.permute.xlu0 %1014  ;;  %v1017_v52 = vpop.permute.xlu1 %1016  ;;  %2967 = vmatprep.mubr.msk.bf16.mxu1 %vm3520_vm0, %v3519_v5  ;;  %3238 = vrcp.f32 %v1475_v45  ;;  %v3167_v45 = vld [vmem:[%s3809_s23 + $0x20] sm:$0xff]  }
 0x400   : > { %v1600_v53 = vsel %vm1506_vm2, %v1015_v51, 0  ;;  %v1646_v54 = vsel %vm1506_vm2, %v1017_v52, 0 }
 0x401   : > { %2960 = vmatpush3.bf16.msra.mxu0 %v1600_v53  ;;  %2966 = vmatpush3.bf16.msra.mxu1 %v1646_v54  ;;  %v3171_v53 = vld [vmem:[%s3809_s23] sm:$0xff]  }
 0x402   : > { %2971 = vmatprep.subr.bf16.mxu0 %v3519_v5  ;;  %2977 = vmatprep.subr.bf16.mxu1 %v3519_v5 }
 0x403   : > { %v1020_v58 = vpop.permute.xlu1 %1019 }
 0x404   : > { %v1738_v63 = vsel %vm1506_vm2, %v1020_v58, 0 }
 0x407   : > { %v1024_v14 = vpop.permute.xlu1 %1023 }
 0x408   : > { %v1830_v17 = vsel %vm1506_vm2, %v1024_v14, 0 }
 0x409   : > { %v3233_v55 = vpop.eup %3232 }
 0x40a   : > { %v3235_v56 = vpop.eup %3234  ;;  %v1490_v57 = vmul.f32 %v3233_v55, %v3223_v23 }
 0x40b   : > { %v1489_v59 = vmul.f32 %v3235_v56, %v3221_v22  ;;  %v3237_v62 = vpop.eup %3236 }
 0x40c   : > { %v1498_v60 = vpack.c.bf16 %v1490_v57, %v1490_v57  ;;  %v1491_v1 = vmul.f32 %v3237_v62, %v3940_v18  ;;  %v3239_v7 = vpop.eup %3238 }
 0x40d   : > { %v1497_v61 = vpack.c.bf16 %v1489_v59, %v1489_v59  ;;  %v1493_v9 = vmul.f32 %v3239_v7, %v3944_v20 }
 0x40e   : > { %2968 = vmatmul.mubr.msk.bf16.vlgmr.msra.gmra.mxu1 %vm1406_vm3, %v1498_v60  ;;  %v1499_v2 = vpack.c.bf16 %v1491_v1, %v1491_v1 }
 0x40f   : > { %2962 = vmatmul.mubr.msk.bf16.vlgmr.msra.gmra.mxu0 %vm1406_vm3, %v1497_v61  ;;  %2978 = vmatpush3.bf16.msra.mxu1 %v1738_v63  ;;  %v1501_v11 = vpack.c.bf16 %v1493_v9, %v1493_v9 }
 0x410   : > { %2972 = vmatpush3.bf16.msra.mxu0 %v1692_v0  ;;  %2973 = vmatprep.mubr.msk.bf16.mxu0 %vm3520_vm0, %v3519_v5 }
 0x411   : > { %2983 = vmatprep.subr.bf16.mxu0 %v3519_v5  ;;  %2979 = vmatprep.mubr.msk.bf16.mxu1 %vm3520_vm0, %v3519_v5 }
 0x412   : > { %2989 = vmatprep.subr.bf16.mxu1 %v3519_v5 }
 0x417   : > { %2974 = vmatmul.mubr.msk.bf16.vlgmr.msra.gmra.mxu0 %vm1406_vm3, %v1499_v2 }
 0x418   : > { %2985 = vmatprep.mubr.msk.bf16.mxu0 %vm3520_vm0, %v3519_v5 }
 0x430   : > { %v1472_v6 = vpop.xlane.xlu0 %1471 }
 0x431   : > { %3240 = vrcp.f32 %v1472_v6 }
 0x434   : > { %v1478_v8 = vpop.xlane.xlu0 %1477 }
 0x435   : > { %3242 = vrcp.f32 %v1478_v8 }
 0x438   : > { %v1022_v10 = vpop.permute.xlu0 %1021 }
 0x439   : > { %v1784_v3 = vsel %vm1506_vm2, %v1022_v10, 0 }
 0x43a   : > { %2984 = vmatpush3.bf16.msra.mxu0 %v1784_v3 }
 0x43b   : > { %2995 = vmatprep.subr.bf16.mxu0 %v3519_v5 }
 0x43d   : > { %2986 = vmatmul.mubr.msk.bf16.vlgmr.msra.gmra.mxu0 %vm1406_vm3, %v1501_v11 }
 0x43e   : > { %v3241_v12 = vpop.eup %3240  ;;  %3011 = vmatprep.mubr.msk.bf16.mxu0 %vm3520_vm0, %v3519_v5  ;;  %2996 = vmatpush3.bf16.msra.mxu0 %v3164_v24 }
 0x43f   : > { %v1492_v13 = vmul.f32 %v3241_v12, %v3960_v44  ;;  %2997 = vmatprep.subr.bf16.mxu0 %v3519_v5 }
 0x441   : > { %v1500_v15 = vpack.c.bf16 %v1492_v13, %v1492_v13 }
 0x442   : > { %v3243_v16 = vpop.eup %3242  ;;  %2998 = vmatpush3.bf16.msra.mxu0 %v3165_v27 }
 0x443   : > { %2980 = vmatmul.mubr.msk.bf16.vlgmr.msra.gmra.mxu1 %vm1406_vm3, %v1500_v15  ;;  %v1494_v18 = vmul.f32 %v3243_v16, %v3966_v40  ;;  %2999 = vmatprep.subr.bf16.mxu0 %v3519_v5 }
 0x444   : > { %2990 = vmatpush3.bf16.msra.mxu1 %v1830_v17  ;;  %2991 = vmatprep.mubr.msk.bf16.mxu1 %vm3520_vm0, %v3519_v5 }
 0x445   : > { %v1502_v19 = vpack.c.bf16 %v1494_v18, %v1494_v18 }
 0x446   : > { %3000 = vmatpush3.bf16.msra.mxu0 %v3166_v28 }
 0x447   : > { %3001 = vmatprep.subr.bf16.mxu0 %v3519_v5 }
 0x44a   : > { %3002 = vmatpush3.bf16.msra.mxu0 %v3167_v45  ;;  %v3193_v45 = vld [vmem:[%s3811_s11] ss:$8 sps:$4 sm:$0xff]  }
 0x44b   : > { %2992 = vmatmul.mubr.msk.bf16.vlgmr.msra.gmra.mxu1 %vm1406_vm3, %v1502_v19  ;;  %3003 = vmatprep.subr.bf16.mxu0 %v3519_v5 }
 0x44c   : > { %2219 = vmatprep.mubr.bf16.mxu1 %v3518_v4 }
 0x44e   : > { %3004 = vmatpush3.bf16.msra.mxu0 %v3168_v46  ;;  %v3196_v46 = vld [vmem:[%s3813_s8 + $0x78] sm:$0xff]  }
 0x44f   : > { %3005 = vmatprep.subr.bf16.mxu0 %v3519_v5 }
 0x452   : > { %3006 = vmatpush3.bf16.msra.mxu0 %v3169_v47  ;;  %v3197_v47 = vld [vmem:[%s3813_s8 + $0x38] sm:$0xff]  }
 0x453   : > { %3007 = vmatprep.subr.bf16.mxu0 %v3519_v5 }
 0x456   : > { %3008 = vmatpush3.bf16.msra.mxu0 %v3170_v49  ;;  %v3199_v49 = vld [vmem:[%s3813_s8 + $0x30] sm:$0xff]  }
 0x457   : > { %3009 = vmatprep.subr.bf16.mxu0 %v3519_v5 }
 0x45a   : > { %3010 = vmatpush3.bf16.msra.mxu0 %v3171_v53  ;;  %v3203_v53 = vld [vmem:[%s3813_s8 + $0x20] sm:$0xff]  }
 0x45b   : > { %2857 = vmatprep.subr.bf16.mxu0 %v3196_v46 }
 0x462   : > { %v4006_v20 = vpop.f32.mrf.mxu0 }
 0x463   : > { %v1872_v11 = vpack.c.bf16 %v4006_v20, %v4006_v20 }
 0x464   : > { %v2951_v21 = vpop.f32.mrf.mxu0 }
 0x465   : > { %v2753_v21 = vld [vmem:[%s4202_s0] ss:$0 sm:$0xff] }
 0x466   : > { %v1547_v22 = vpop.f32.mrf.mxu0 }
 0x468   : > { %v2952_v23 = vpop.f32.mrf.mxu0 }
 0x4be   : > { %v1590_v29 = vpop.f32.mrf.mxu1 }
 0x4bf   : > { %v1873_v30 = vpack.c.bf16 %v1590_v29, %v1590_v29 }
 0x4c0   : > { %v2957_v4 = vpop.f32.mrf.mxu1 }
 0x4c1   : > { %1881 = vrot.lane.b32.xlu0 %v1873_v30, %s3523_s7 }
 0x4c2   : > { %v1593_v31 = vpop.f32.mrf.mxu1 }
 0x4c3   : > { %v3174_v31 = vld [vmem:[%s3811_s11 + $0x74] ss:$8 sps:$4 sm:$0xff]  }
 0x4c4   : > { %v2958_v32 = vpop.f32.mrf.mxu1  ;;  %2187 = vmatprep.subr.bf16.mxu1 %v3174_v31 }
 0x4c5   : > { %v3172_v32 = vld [vmem:[%s3811_s11 + $0x70] ss:$8 sps:$4 sm:$0xff]  }
 0x4c6   : > { %2188 = vmatpush1.bf16.msra.mxu1 %v3172_v32 }
 0x4ce   : > { %v1682_v33 = vpop.f32.mrf.mxu1 }
 0x4cf   : > { %v1636_v34 = vpop.f32.mrf.mxu0  ;;  %v1875_v5 = vpack.c.bf16 %v1682_v33, %v1682_v33  ;;  %v3175_v33 = vld [vmem:[%s3811_s11 + $0x60] ss:$8 sps:$4 sm:$0xff]  }
 0x4d0   : > { %v2969_v35 = vpop.f32.mrf.mxu1  ;;  %v1874_v59 = vpack.c.bf16 %v1636_v34, %v1636_v34  ;;  %v3180_v34 = vld [vmem:[%s3811_s11 + $0x54] ss:$8 sps:$4 sm:$0xff]  }
 0x4d1   : > { %v2963_v36 = vpop.f32.mrf.mxu0  ;;  %v3178_v35 = vld [vmem:[%s3811_s11 + $0x50] ss:$8 sps:$4 sm:$0xff]  }
 0x4d2   : > { %v1685_v37 = vpop.f32.mrf.mxu1  ;;  %v3183_v36 = vld [vmem:[%s3811_s11 + $0x44] ss:$8 sps:$4 sm:$0xff]  }
 0x4d3   : > { %v1639_v38 = vpop.f32.mrf.mxu0  ;;  %v3181_v37 = vld [vmem:[%s3811_s11 + $0x40] ss:$8 sps:$4 sm:$0xff]  }
 0x4d4   : > { %v2970_v44 = vpop.f32.mrf.mxu1  ;;  %v3186_v38 = vld [vmem:[%s3811_s11 + $0x34] ss:$8 sps:$4 sm:$0xff]  }
 0x4d5   : > { %v2964_v39 = vpop.f32.mrf.mxu0  ;;  %v3184_v44 = vld [vmem:[%s3811_s11 + $0x30] ss:$8 sps:$4 sm:$0xff]  }
 0x4d6   : > { %v3189_v39 = vld [vmem:[%s3811_s11 + $0x24] ss:$8 sps:$4 sm:$0xff]  }
 0x4d7   : > { %v1728_v40 = vpop.f32.mrf.mxu0 }
 0x4d8   : > { %v1876_v7 = vpack.c.bf16 %v1728_v40, %v1728_v40  ;;  %v3187_v40 = vld [vmem:[%s3811_s11 + $0x20] ss:$8 sps:$4 sm:$0xff]  }
 0x4d9   : > { %v2975_v41 = vpop.f32.mrf.mxu0 }
 0x4da   : > { %v3192_v41 = vld [vmem:[%s3811_s11 + $0x14] ss:$8 sps:$4 sm:$0xff]  }
 0x4db   : > { %v1731_v42 = vpop.f32.mrf.mxu0 }
 0x4dc   : > { %v3190_v42 = vld [vmem:[%s3811_s11 + $0x10] ss:$8 sps:$4 sm:$0xff]  }
 0x4dd   : > { %v2976_v43 = vpop.f32.mrf.mxu0 }
 0x4de   : > { %v3195_v43 = vld [vmem:[%s3811_s11 + $0x4] ss:$8 sps:$4 sm:$0xff]  }
 0x4fd   : > { %v1820_v48 = vpop.f32.mrf.mxu0 }
 0x4fe   : > { %v1878_v50 = vpack.c.bf16 %v1820_v48, %v1820_v48  ;;  %v3198_v48 = vld [vmem:[%s3813_s8 + $0x70] sm:$0xff]  }
 0x4ff   : > { %v2987_v51 = vpop.f32.mrf.mxu0 }
 0x500   : > { %1902 = vrot.lane.b32.xlu1 %v1878_v50, %s3521_s1  ;;  %v3200_v50 = vld [vmem:[%s3813_s8 + $0x68] sm:$0xff]  }
 0x501   : > { %v1823_v52 = vpop.f32.mrf.mxu0  ;;  %v3201_v51 = vld [vmem:[%s3813_s8 + $0x28] sm:$0xff]  }
 0x502   : > { %v3202_v52 = vld [vmem:[%s3813_s8 + $0x60] sm:$0xff]  }
 0x503   : > { %v1774_v54 = vpop.f32.mrf.mxu1  ;;  %v2988_v55 = vpop.f32.mrf.mxu0 }
 0x504   : > { %v1877_v56 = vpack.c.bf16 %v1774_v54, %v1774_v54  ;;  %v3204_v54 = vld [vmem:[%s3813_s8 + $0x58] sm:$0xff]  }
 0x505   : > { %v2981_v57 = vpop.f32.mrf.mxu1  ;;  %v3205_v55 = vld [vmem:[%s3813_s8 + $0x18] sm:$0xff]  }
 0x506   : > { %1899 = vrot.lane.b32.xlu0 %v1877_v56, %s3523_s7 }
 0x507   : > { %v1777_v58 = vpop.f32.mrf.mxu1 }
 0x509   : > { %v2982_v60 = vpop.f32.mrf.mxu1 }
 0x50a   : > { %1884 = vrot.lane.b32.xlu0 %v1874_v59, %s3521_s1 }
 0x50b   : > { %v1866_v61 = vpop.f32.mrf.mxu1 }
 0x50c   : > { %v1879_v62 = vpack.c.bf16 %v1866_v61, %v1866_v61 }
 0x50d   : > { %v2993_v63 = vpop.f32.mrf.mxu1 }
 0x50e   : > { %1905 = vrot.lane.b32.xlu1 %v1879_v62, %s3522_s3 }
 0x50f   : > { %v1869_v0 = vpop.f32.mrf.mxu1 }
 0x511   : > { %v2994_v1 = vpop.f32.mrf.mxu1 }
 0x512   : > { %1887 = vrot.lane.b32.xlu1 %v1875_v5, %s3522_s3 }
 0x533   : > { %v1882_v2 = vpop.permute.xlu0 %1881 }
 0x534   : > { %v1891_v14 = vsel %vm1037_vm1, %v1872_v11, %v1882_v2 }
 0x572   : > { %v1903_v8 = vpop.permute.xlu1 %1902 }
 0x578   : > { %v1900_v6 = vpop.permute.xlu0 %1899 }
 0x579   : > { %v1909_v9 = vsel %vm1037_vm1, %v1876_v7, %v1900_v6 }
 0x57a   : > { %v1911_v10 = vsel %vm1892_vm4, %v1909_v9, %v1903_v8 }
 0x57c   : > { %v1885_v12 = vpop.permute.xlu0 %1884 }
 0x57d   : > { %v1894_v15 = vsel %vm1892_vm4, %v1891_v14, %v1885_v12 }
 0x580   : > { %v1906_v3 = vpop.permute.xlu1 %1905 }
 0x581   : > { %v1913_v13 = vsel %vm1895_vm5, %v1911_v10, %v1906_v3  ;;  %v2762_v3 = vld [vmem:[%s711_s30] ss:$0 sm:$0xff] }
 0x582   : > { %v1915_v16 = vrot.slane %v1913_v13, 4 }
 0x584   : > { %v1888_v17 = vpop.permute.xlu1 %1887 }
 0x585   : > { %v1897_v18 = vsel %vm1895_vm5, %v1894_v15, %v1888_v17  ;;  %v2763_v15 = vld [vmem:[%s714_s18] ss:$0 sm:$0xff] }
 0x586   : > { %v1917_v19 = vsel %vm1506_vm2, %v1897_v18, %v1915_v16 }
 0x587   : > { %3012 = vmatmul.mubr.bf16.vlgmr.msra.gmra.mxu0 %v1917_v19 }
 0x588   : > { %2858 = vmatpush3.bf16.msra.mxu0 %v3197_v47  ;;  %v2780_v47 = vld [vmem:[%s708_s20] ss:$0 sm:$0xff] }
 0x589   : > { %2859 = vmatprep.subr.bf16.mxu0 %v3198_v48 }
 0x58c   : > { %2860 = vmatpush3.bf16.msra.mxu0 %v3199_v49 }
 0x58d   : > { %2861 = vmatprep.subr.bf16.mxu0 %v3200_v50 }
 0x590   : > { %2862 = vmatpush3.bf16.msra.mxu0 %v3201_v51 }
 0x591   : > { %2863 = vmatprep.subr.bf16.mxu0 %v3202_v52 }
 0x594   : > { %2864 = vmatpush3.bf16.msra.mxu0 %v3203_v53 }
 0x595   : > { %2865 = vmatprep.subr.bf16.mxu0 %v3204_v54 }
 0x598   : > { %2866 = vmatpush3.bf16.msra.mxu0 %v3205_v55 }
 0x647   : > { %v2024_v22 = vpop.f32.mrf.mxu0 }
 0x648   : > { %v2025_v20 = vadd.f32 %v2753_v21, %v2024_v22  ;;  %v3207_v22 = vld [vmem:[%s3813_s8 + $0x10] sm:$0xff]  }
 0x649   : > { %v3013_v23 = vpop.f32.mrf.mxu0 }
 0x64a   : > { %v4040_v24 = vadd.f32 %v2025_v20, %v3842_v25  ;;  %v3208_v20 = vld [vmem:[%s3813_s8 + $0x48] sm:$0xff]  }
 0x64b   : > { %v2027_v27 = vpop.f32.mrf.mxu0  ;;  %v3209_v23 = vld [vmem:[%s3813_s8 + $0x8] sm:$0xff]  }
 0x64c   : > { %v2028_v28 = vadd.f32 %v2753_v21, %v2027_v27  ;;  %2033 = vadd.xlane.f32.xlu0 %v4040_v24  ;;  %v2040_v4 = vmul.f32 %v4040_v24, %v4040_v24  ;;  %v3206_v21 = vld [vmem:[%s3813_s8 + $0x50] sm:$0xff]   ;;  %v3211_v27 = vld [vmem:[%s3813_s8] sm:$0xff]  }
 0x64d   : > { %v3014_v29 = vpop.f32.mrf.mxu0  ;;  %2867 = vmatprep.subr.bf16.mxu0 %v3206_v21 }
 0x64e   : > { %v4044_v30 = vadd.f32 %v2028_v28, %v3844_v26  ;;  %v3177_v26 = vld [vmem:[%s3811_s11 + $0x64] ss:$8 sps:$4 sm:$0xff]   ;;  %2868 = vmatpush3.bf16.msra.mxu0 %v3207_v22  ;;  %v2097_v28 = vlaneseq }
 0x64f   : > { %2189 = vmatprep.subr.bf16.mxu1 %v3177_v26  ;;  %2869 = vmatprep.subr.bf16.mxu0 %v3208_v20 }
 0x650   : > { %2042 = vadd.xlane.f32.xlu0 %v2040_v4  ;;  %2035 = vadd.xlane.f32.xlu1 %v4044_v30  ;;  %v2041_v25 = vmul.f32 %v4044_v30, %v4044_v30  ;;  %v2098_v29 = vshrl.u32 %v2097_v28, 7 }
 0x651   : > { %2190 = vmatpush1.bf16.msra.mxu1 %v3175_v33 }
 0x652   : > { %2191 = vmatprep.subr.bf16.mxu1 %v3180_v34  ;;  %2870 = vmatpush3.bf16.msra.mxu0 %v3209_v23  ;;  %v2099_v4 = vsub.s32 0, %v2098_v29 }
 0x654   : > { %2044 = vadd.xlane.f32.xlu0 %v2041_v25  ;;  %v2095_v25 = vld [vmem:[%s3787_s19] sm:$0x3] }
 0x655   : > { %2192 = vmatpush1.bf16.msra.mxu1 %v3178_v35  ;;  %v2100_v26 = vrot.slane %v2095_v25, %v2099_v4 }
 0x656   : > { %2193 = vmatprep.subr.bf16.mxu1 %v3183_v36 }
 0x659   : > { %2194 = vmatpush1.bf16.msra.mxu1 %v3181_v37 }
 0x65a   : > { %2195 = vmatprep.subr.bf16.mxu1 %v3186_v38 }
 0x65d   : > { %2196 = vmatpush1.bf16.msra.mxu1 %v3184_v44 }
 0x65e   : > { %2197 = vmatprep.subr.bf16.mxu1 %v3189_v39 }
 0x661   : > { %2198 = vmatpush1.bf16.msra.mxu1 %v3187_v40 }
 0x662   : > { %2199 = vmatprep.subr.bf16.mxu1 %v3192_v41 }
 0x665   : > { %2200 = vmatpush1.bf16.msra.mxu1 %v3190_v42 }
 0x666   : > { %2201 = vmatprep.subr.bf16.mxu1 %v3195_v43 }
 0x669   : > { %2202 = vmatpush1.bf16.msra.mxu1 %v3193_v45 }
 0x6d5   : > { %v2034_v56 = vpop.xlane.xlu0 %2033 }
 0x6d6   : > { %v2038_v57 = vmul.f32 0.0078125, %v2034_v56 }
 0x6d8   : > { %v2048_v60 = vmul.f32 %v2038_v57, %v2038_v57  ;;  %v2052_v8 = vsub.f32 %v4040_v24, %v2038_v57  ;;  %v3210_v24 = vld [vmem:[%s3813_s8 + $0x40] sm:$0xff]  }
 0x6d9   : > { %v2043_v58 = vpop.xlane.xlu0 %2042  ;;  %v2036_v59 = vpop.xlane.xlu1 %2035  ;;  %2871 = vmatprep.subr.bf16.mxu0 %v3210_v24 }
 0x6da   : > { %v2046_v61 = vmul.f32 0.0078125, %v2043_v58  ;;  %v2039_v62 = vmul.f32 0.0078125, %v2036_v59  ;;  %2872 = vmatpush3.bf16.msra.mxu0 %v3211_v27 }
 0x6dc   : > { %v2050_v63 = vsub.f32 %v2046_v61, %v2048_v60  ;;  %v2049_v1 = vmul.f32 %v2039_v62, %v2039_v62  ;;  %v2053_v11 = vsub.f32 %v4044_v30, %v2039_v62  ;;  %v2103_v30 = vsub.s32 1, %v2098_v29 }
 0x6dd   : > { %v2045_v0 = vpop.xlane.xlu0 %2044 }
 0x6de   : > { %v2054_v5 = vadd.f32 1e-06, %v2050_v63  ;;  %v2047_v2 = vmul.f32 0.0078125, %v2045_v0  ;;  %v2104_v32 = vrot.slane %v2095_v25, %v2103_v30 }
 0x6e0   : > { %3244 = vrsqrt.f32 %v2054_v5  ;;  %v2051_v6 = vsub.f32 %v2047_v2, %v2049_v1 }
 0x6e2   : > { %v2055_v7 = vadd.f32 1e-06, %v2051_v6 }
 0x6e4   : > { %3246 = vrsqrt.f32 %v2055_v7 }
 0x6ed   : > { %v3245_v9 = vpop.eup %3244 }
 0x6ee   : > { %v2058_v10 = vmul.f32 %v3245_v9, %v2052_v8 }
 0x6f0   : > { %v2067_v14 = vmul.f32 %v2762_v3, %v2058_v10 }
 0x6f1   : > { %v3247_v12 = vpop.eup %3246 }
 0x6f2   : > { %v2059_v13 = vmul.f32 %v3247_v12, %v2053_v11  ;;  %v2076_v17 = vadd.f32 %v2763_v15, %v2067_v14  ;;  %v2797_v12 = vld [vmem:[%s717_s5] ss:$0 sm:$0xff] }
 0x6f3   : > { %v2798_v14 = vld [vmem:[%s720_s24] ss:$0 sm:$0xff] }
 0x6f4   : > { %v2068_v16 = vmul.f32 %v2762_v3, %v2059_v13 }
 0x6f6   : > { %v2077_v18 = vadd.f32 %v2763_v15, %v2068_v16 }
 0x6f8   : > { %v2078_v19 = vpack.c.bf16 %v2077_v18, %v2076_v17 }
 0x6fa   : > { %2220 = vmatmul.mubr.bf16.vlgmr.msra.gmra.mxu1 %v2078_v19 }
 0x7ba   : > { %v2221_v31 = vpop.f32.mrf.mxu1 }
 0x7bb   : > { %v2222_v37 = vadd.f32 %v2221_v31, %v2100_v26 }
 0x7bc   : > { %v2223_v33 = vpop.f32.mrf.mxu1 }
 0x7bd   : > { %v2224_v35 = vadd.f32 %v2223_v33, %v2104_v32  ;;  %v2230_v42 = vmax.f32 %v2222_v37, 0.0 }
 0x7be   : > { %v2225_v34 = vpop.f32.mrf.mxu1 }
 0x7bf   : > { %v2226_v36 = vadd.f32 %v2225_v34, %v2100_v26  ;;  %v2231_v40 = vmax.f32 %v2224_v35, 0.0 }
 0x7c0   : > { %v2227_v38 = vpop.f32.mrf.mxu1 }
 0x7c1   : > { %v2228_v44 = vadd.f32 %v2227_v38, %v2104_v32  ;;  %v2232_v39 = vmax.f32 %v2226_v36, 0.0 }
 0x7c3   : > { %v2233_v41 = vmax.f32 %v2228_v44, 0.0  ;;  %v2234_v45 = vpack.c.bf16 %v2232_v39, %v2230_v42 }
 0x7c5   : > { %v2235_v43 = vpack.c.bf16 %v2233_v41, %v2231_v40 }
 0x7c7   : > { %2403 = vmatprep.mubr.bf16.mxu0 %v2235_v43 }
 0x7c8   : > { %2404 = vmatmul.mubr.bf16.vlgmr.msra.gmra.mxu0 %v2234_v45 }
 0x888   : > { %v2873_v46 = vpop.f32.mrf.mxu0 }
 0x88a   : > { %v2874_v48 = vpop.f32.mrf.mxu0 }
 0x88b   : > { %v2875_v49 = vadd.f32 %v2874_v48, %v2873_v46 }
 0x88c   : > { %v2876_v50 = vpop.f32.mrf.mxu0 }
 0x88d   : > { %v2406_v51 = vadd.f32 %v2875_v49, %v2780_v47 }
 0x88e   : > { %v2877_v52 = vpop.f32.mrf.mxu0 }
 0x88f   : > { %v2878_v53 = vadd.f32 %v2877_v52, %v2876_v50  ;;  %v2412_v54 = vadd.f32 %v2406_v51, %v2076_v17 }
 0x891   : > { %v2409_v55 = vadd.f32 %v2878_v53, %v2780_v47  ;;  %2414 = vadd.xlane.f32.xlu1 %v2412_v54  ;;  %v2420_v57 = vmul.f32 %v2412_v54, %v2412_v54 }
 0x893   : > { %v2413_v56 = vadd.f32 %v2409_v55, %v2077_v18 }
 0x895   : > { %2416 = vadd.xlane.f32.xlu0 %v2413_v56  ;;  %2422 = vadd.xlane.f32.xlu1 %v2420_v57  ;;  %v2421_v58 = vmul.f32 %v2413_v56, %v2413_v56 }
 0x899   : > { %2424 = vadd.xlane.f32.xlu0 %v2421_v58 }
 0x91a   : > { %v2415_v59 = vpop.xlane.xlu1 %2414 }
 0x91b   : > { %v2418_v60 = vmul.f32 0.0078125, %v2415_v59 }
 0x91d   : > { %v2428_v63 = vmul.f32 %v2418_v60, %v2418_v60  ;;  %v2432_v3 = vsub.f32 %v2412_v54, %v2418_v60 }
 0x91e   : > { %v2417_v61 = vpop.xlane.xlu0 %2416  ;;  %v2423_v62 = vpop.xlane.xlu1 %2422 }
 0x91f   : > { %v2419_v0 = vmul.f32 0.0078125, %v2417_v61  ;;  %v2426_v5 = vmul.f32 0.0078125, %v2423_v62 }
 0x921   : > { %v2430_v1 = vsub.f32 %v2426_v5, %v2428_v63  ;;  %v2429_v6 = vmul.f32 %v2419_v0, %v2419_v0  ;;  %v2433_v15 = vsub.f32 %v2413_v56, %v2419_v0 }
 0x922   : > { %v2425_v2 = vpop.xlane.xlu0 %2424 }
 0x923   : > { %v2434_v7 = vadd.f32 1e-06, %v2430_v1  ;;  %v2427_v8 = vmul.f32 0.0078125, %v2425_v2 }
 0x925   : > { %3248 = vrsqrt.f32 %v2434_v7  ;;  %v2431_v9 = vsub.f32 %v2427_v8, %v2429_v6 }
 0x927   : > { %v2435_v10 = vadd.f32 1e-06, %v2431_v9 }
 0x929   : > { %3250 = vrsqrt.f32 %v2435_v10 }
 0x932   : > { %v3249_v11 = vpop.eup %3248 }
 0x933   : > { %v2438_v13 = vmul.f32 %v3249_v11, %v2432_v3 }
 0x935   : > { %v2447_v16 = vmul.f32 %v2797_v12, %v2438_v13 }
 0x936   : > { %v3251_v17 = vpop.eup %3250 }
 0x937   : > { %v2456_v18 = vadd.f32 %v2798_v14, %v2447_v16  ;;  %v2439_v19 = vmul.f32 %v3251_v17, %v2433_v15 }
 0x939   : > { %2458 = vst [vmem:[#allocation2] sm:$0xff] %v2456_v18  ;;  %v2448_v21 = vmul.f32 %v2797_v12, %v2439_v19  ;;  %2463 = sbr.rel (%p2799_p12) target bundleno = 2367 (0x93f), region = 104 }
 0x93b   : > { %v2457_v22 = vadd.f32 %v2798_v14, %v2448_v21 }
 0x93d   : > { %2459 = vst [vmem:[#allocation2 + $0x8] sm:$0xff] %v2457_v22 }
 0x93e   : > { %2464 = vst [vmem:[#allocation12] sm:$0xff] %v2456_v18  ;;  %2465 = vst [vmem:[#allocation12 + $0x8] sm:$0xff] %v2457_v22 }
 0x93f PF: > { %p3063_p13 = scmp.eq.s32.totalorder %s3626_s14, 1  ;;  %s3524_s5 = smov [#allocation12]  }
 0x940   : > { %s2475_s2 = sshll.u32 %s3524_s5, 4  ;;  %s2476_s2 = int_to_ptr.vmem [resolvable:$true] %s2475_s2 }
 0x941   : > { %s3416_s24 = scalar_lea.vmem %s2476_s2, 256  ;;  %p3423_p4 = scmp.lt.s32.totalorder %s2476_s2, %s2476_s2 }
 0x942   : > { %p3417_p7 = scmp.ne.s32.totalorder %s2476_s2, %s3416_s24  ;;  %p3424_p3 = scmp.lt.s32.totalorder %s3416_s24, %s3416_s24 }
 0x944   : > { %p3418_p9 = pnand %p3417_p7, %p3063_p13  ;;  %p3425_p1 = por %p3424_p3, %p3423_p4 }
 0x946   : > { %p3419_p11 = pneg %p3418_p9 }
 0x948   : > { %p3426_p10 = pnand %p3425_p1, %p3419_p11 }
 0x94a   : > { %3429 = shalt.err (!%p3426_p10)
}
 0x94b   : > { %s3525_s28 = smov 128   ;;  %s3526_s11 = smov 8  }
 0x94c   : > { %s4208_s3 = sld [smem:[#allocation33_spill]] }
 0x952   : > { %3035 = dma.vmem_to_hbm [thread:$0]  (%p3063_p13), %s2476_s2, 256, %s4208_s3, [#allocation5], %s3525_s28, %s3525_s28, %s3526_s11  }
 0x953   : > { %3477 = dma.done.wait (%p3063_p13), [#allocation5], 256  }
 0x954   : > { %3479 = vsyncadd (%p3063_p13), [#allocation5], 4294967040 }
 0x955 PF: > { %s4209_s7 = sld [smem:[#allocation18_spill]]  ;;  %s4213_s25 = smov %s3486_s26 }
 0x956   : > { %s4210_s6 = sld [smem:[#allocation17_spill]]  ;;  %s4215_s28 = smov %s3498_s29 }
 0x957   : > { %s4211_s27 = sld [smem:[#allocation20_spill]] }
 0x958   : > { %s4212_s15 = sld [smem:[#allocation19_spill]] }
 0x95b   : > { %s26_s30 = sadd.s32 1, %s4209_s7  }
 0x95c   : > { %p23_p0 = scmp.ge.s32.totalorder %s26_s30, 4   ;;  %s4214_s26 = smov %s4210_s6 }
 0x95e   : > { %s4216_s29 = smov %s4212_s15  ;;  %25 = sbr.rel (!%p23_p0) target bundleno = 19 (0x13), region = 181 }
 0x963   :  { %2491 = vsyncpa [#allocation4], 1 }
 0x964   :  { %2493 = vsyncpa [#allocation4 + $0x1], 1 }
 0x965   :  { %2494 = vsyncpa [#allocation7], 1 }
 0x966   :  { %2495 = vsyncpa [#allocation5], 1 }
 0x967   :  { %2497 = vsyncpa [#allocation5 + $0x1], 1 }

</bundles_post_ra>
